<compile_context>
chip_gen: v5e
topology: v5e:2x2
jax: 0.10.0
libtpu: 0.0.40
codegen_flags: <defaults>
</compile_context>

<pallas_src>
import jax
import jax.numpy as jnp
from jax.experimental import pallas as pl
from jax.experimental.pallas import tpu as pltpu

# ---- model dims (emb_dim == hid_dim so per-layer fused input weights stack cleanly) ----
VOCAB = 256       # output_dim (vocab size)
EMB = 128         # emb_dim
HID = 128         # hid_dim
N_LAYERS = 2
BATCH = 8         # NOTE: the MXU M-dim is 128/256 rows; batching more concurrent decode
                  # streams into one call is the biggest throughput lever if available.


def decoder_kernel(ids_ref, h0_ref, c0_ref, emb_ref, w_ref, b_ref, wout_ref, bout_ref,
                   pred_ref, hout_ref, cout_ref, xh_ref):
    """Grid step t == one decode step. LSTM state lives in the revisited output refs."""
    t = pl.program_id(0)

    # ---- first step: seed the VMEM-resident state from the caller-provided hidden/cell ----
    @pl.when(t == 0)
    def _():
        hout_ref[...] = h0_ref[...]
        cout_ref[...] = c0_ref[...]

    # ---- embedding lookup inside the kernel (exact): one-hot rows @ table on the MXU.
    #      Token ids are scalars read from SMEM; the one-hot is built row by row so no
    #      small 1-D vector has to be materialized from scalars. ----
    col = jax.lax.broadcasted_iota(jnp.int32, (BATCH, VOCAB), 1)
    row = jax.lax.broadcasted_iota(jnp.int32, (BATCH, VOCAB), 0)
    onehot = None
    for b in range(BATCH):
        m = jnp.logical_and(row == b, col == ids_ref[t, b])
        onehot = m if onehot is None else jnp.logical_or(onehot, m)
    x = jnp.dot(onehot.astype(jnp.bfloat16), emb_ref[...],
                preferred_element_type=jnp.float32)                     # [B, EMB] f32
    # dropout = identity (eval mode)

    for layer in range(N_LAYERS):                                       # static layer loop
        h = hout_ref[layer]                                             # [B, HID] f32
        c = cout_ref[layer]                                             # [B, HID] f32
        # persistent bf16 scratch xh = [x | h]; fused gate matmul with K = 2H = 256
        xh_ref[:, 0:HID] = x.astype(jnp.bfloat16)
        xh_ref[:, HID:2 * HID] = h.astype(jnp.bfloat16)
        gates = (jnp.dot(xh_ref[...], w_ref[layer],
                         preferred_element_type=jnp.float32)
                 + b_ref[layer])                                        # [B, 4H] f32
        # PyTorch LSTM gate order: input, forget, cell(g), output (128-lane aligned slices)
        i_g = jax.nn.sigmoid(gates[:, 0 * HID:1 * HID])
        f_g = jax.nn.sigmoid(gates[:, 1 * HID:2 * HID])
        g_g = jnp.tanh(gates[:, 2 * HID:3 * HID])
        o_g = jax.nn.sigmoid(gates[:, 3 * HID:4 * HID])
        c_new = f_g * c + i_g * g_g
        h_new = o_g * jnp.tanh(c_new)
        hout_ref[layer] = h_new
        cout_ref[layer] = c_new
        x = h_new                                                       # feeds next layer

    # final linear: prediction = h_top @ W_out^T + b_out  (lane-dense [B, VOCAB] slab)
    pred_ref[0] = (jnp.dot(x.astype(jnp.bfloat16), wout_ref[...],
                           preferred_element_type=jnp.float32)
                   + bout_ref[...])


@jax.jit
def _decode_pallas(ids_tb, hidden, cell, embedding, w_cat, bias, wout_t, bout):
    """T-step decode: weights DMA'd once, state resident in VMEM, logits per step."""
    T = ids_tb.shape[0]

    # advisory cost hint for the XLA scheduler around the custom call
    flops = T * 2 * BATCH * (VOCAB * EMB                        # in-kernel embedding gather
                             + N_LAYERS * (2 * HID) * (4 * HID)  # fused gate matmuls
                             + HID * VOCAB)                      # output projection
    transcendentals = T * 5 * BATCH * HID * N_LAYERS             # 3 sigmoid + 2 tanh / cell
    weight_bytes = sum(int(a.size) * a.dtype.itemsize
                       for a in (embedding, w_cat, bias, wout_t, bout))
    bytes_accessed = int(weight_bytes
                         + 4 * N_LAYERS * BATCH * HID * 4        # h/c in + out (once)
                         + T * (BATCH * 4 + BATCH * VOCAB * 4))  # ids + per-step logits

    c3 = lambda t: (0, 0, 0)   # constant block index -> VMEM-resident across the grid
    c2 = lambda t: (0, 0)

    preds, h_out, c_out = pl.pallas_call(
        decoder_kernel,
        grid=(T,),
        in_specs=[
            pl.BlockSpec(memory_space=pltpu.MemorySpace.SMEM),          # ids [T, B] int32
            pl.BlockSpec((N_LAYERS, BATCH, HID), c3),                   # hidden (read @ t=0)
            pl.BlockSpec((N_LAYERS, BATCH, HID), c3),                   # cell   (read @ t=0)
            pl.BlockSpec((VOCAB, EMB), c2),                             # embedding   bf16
            pl.BlockSpec((N_LAYERS, 2 * HID, 4 * HID), c3),             # fused W     bf16
            pl.BlockSpec((N_LAYERS, 1, 4 * HID), c3),                   # fused bias  f32
            pl.BlockSpec((HID, VOCAB), c2),                             # W_out^T     bf16
            pl.BlockSpec((1, VOCAB), c2),                               # b_out       f32
        ],
        out_specs=(
            pl.BlockSpec((1, BATCH, VOCAB), lambda t: (t, 0, 0)),       # per-step logits
            pl.BlockSpec((N_LAYERS, BATCH, HID), c3),                   # h state (resident)
            pl.BlockSpec((N_LAYERS, BATCH, HID), c3),                   # c state (resident)
        ),
        out_shape=(
            jax.ShapeDtypeStruct((T, BATCH, VOCAB), jnp.float32),
            jax.ShapeDtypeStruct((N_LAYERS, BATCH, HID), jnp.float32),
            jax.ShapeDtypeStruct((N_LAYERS, BATCH, HID), jnp.float32),
        ),
        scratch_shapes=[pltpu.VMEM((BATCH, 2 * HID), jnp.bfloat16)],    # xh = [x | h]
        input_output_aliases={1: 1, 2: 2},                              # hidden/cell in-place
        compiler_params=pltpu.CompilerParams(dimension_semantics=("arbitrary",)),
        cost_estimate=pl.CostEstimate(flops=flops,
                                      transcendentals=transcendentals,
                                      bytes_accessed=bytes_accessed),
    )(ids_tb, hidden, cell, embedding, w_cat, bias, wout_t, bout)
    return preds, h_out, c_out


def decoder_forward_seq(token_ids, hidden, cell, params):
    """Decode T given tokens (teacher-forcing); returns logits [T,B,VOCAB] + final state."""
    ids_tb = token_ids.astype(jnp.int32)
    return _decode_pallas(ids_tb, hidden, cell,
                          params["embedding"], params["w_cat"], params["bias"],
                          params["wout_t"], params["bout"])


def decoder_forward(input_ids, hidden, cell, params):
    """Single-step forward matching the PyTorch module: (prediction, hidden, cell)."""
    preds, h_out, c_out = decoder_forward_seq(input_ids.reshape(1, BATCH), hidden, cell, params)
    return preds[0], h_out, c_out


def init_params(key):
    ks = jax.random.split(key, 8)
    s = 0.05
    embedding = s * jax.random.normal(ks[0], (VOCAB, EMB), jnp.float32)
    # PyTorch shapes: W_ih [4H, in], W_hh [4H, H], b_ih/b_hh [4H]  (in == EMB == HID)
    w_ih = s * jax.random.normal(ks[1], (N_LAYERS, 4 * HID, EMB), jnp.float32)
    w_hh = s * jax.random.normal(ks[2], (N_LAYERS, 4 * HID, HID), jnp.float32)
    b_ih = s * jax.random.normal(ks[3], (N_LAYERS, 4 * HID), jnp.float32)
    b_hh = s * jax.random.normal(ks[4], (N_LAYERS, 4 * HID), jnp.float32)
    w_out = s * jax.random.normal(ks[5], (VOCAB, HID), jnp.float32)   # nn.Linear weight
    b_out = s * jax.random.normal(ks[6], (VOCAB,), jnp.float32)

    # pre-transposed + fused [W_ih; W_hh] for xh @ W layout inside the kernel (K = 2H)
    w_ih_t = jnp.transpose(w_ih, (0, 2, 1))                            # [L, EMB, 4H]
    w_hh_t = jnp.transpose(w_hh, (0, 2, 1))                            # [L, HID, 4H]
    w_cat = jnp.concatenate([w_ih_t, w_hh_t], axis=1)                  # [L, 2H, 4H]

    return {
        # bf16 weights (halve HBM traffic); biases/state stay f32
        "embedding": embedding.astype(jnp.bfloat16),                   # [VOCAB, EMB] bf16
        "w_cat": w_cat.astype(jnp.bfloat16),                           # [L, 2H, 4H] bf16
        "bias": (b_ih + b_hh).reshape(N_LAYERS, 1, 4 * HID),           # [L, 1, 4H]  f32
        "wout_t": jnp.transpose(w_out).astype(jnp.bfloat16),           # [HID, VOCAB] bf16
        "bout": b_out.reshape(1, VOCAB),                               # [1, VOCAB]  f32
        # keep f32 originals for the pure-JAX reference
        "_embedding": embedding,
        "_w_ih": w_ih, "_w_hh": w_hh, "_b_ih": b_ih, "_b_hh": b_hh,
        "_w_out": w_out, "_b_out": b_out,
    }


def decoder_reference(input_ids, hidden, cell, params):
    """Pure-JAX f32 reference mirroring the PyTorch forward (eval mode, one step)."""
    x = jnp.take(params["_embedding"], input_ids, axis=0)
    h_new, c_new = [], []
    for l in range(N_LAYERS):
        gates = (x @ params["_w_ih"][l].T + params["_b_ih"][l]
                 + hidden[l] @ params["_w_hh"][l].T + params["_b_hh"][l])
        i_g = jax.nn.sigmoid(gates[:, 0 * HID:1 * HID])
        f_g = jax.nn.sigmoid(gates[:, 1 * HID:2 * HID])
        g_g = jnp.tanh(gates[:, 2 * HID:3 * HID])
        o_g = jax.nn.sigmoid(gates[:, 3 * HID:4 * HID])
        c_l = f_g * cell[l] + i_g * g_g
        h_l = o_g * jnp.tanh(c_l)
        h_new.append(h_l)
        c_new.append(c_l)
        x = h_l
    pred = x @ params["_w_out"].T + params["_b_out"]
    return pred, jnp.stack(h_new), jnp.stack(c_new)


if __name__ == "__main__":
    key = jax.random.PRNGKey(0)
    k_in, k_h, k_c, k_p = jax.random.split(key, 4)

    T = 4
    token_ids = jax.random.randint(k_in, (T, BATCH), 0, VOCAB, dtype=jnp.int32)
    hidden = 0.1 * jax.random.normal(k_h, (N_LAYERS, BATCH, HID), jnp.float32)
    cell = 0.1 * jax.random.normal(k_c, (N_LAYERS, BATCH, HID), jnp.float32)
    params = init_params(k_p)

    # ---- single decode step (module-equivalent forward) ----
    pred1, h1, c1 = decoder_forward(token_ids[0], hidden, cell, params)
    jax.block_until_ready((pred1, h1, c1))
    pred1_ref, h1_ref, c1_ref = decoder_reference(token_ids[0], hidden, cell, params)
    assert pred1.shape == (BATCH, VOCAB)
    assert h1.shape == (N_LAYERS, BATCH, HID) and c1.shape == (N_LAYERS, BATCH, HID)
    # tolerances loosened vs. the f32 reference because weights are bf16 in the kernel
    for a, b in ((pred1, pred1_ref), (h1, h1_ref), (c1, c1_ref)):
        if not jnp.allclose(a, b, rtol=5e-2, atol=1e-2):
            raise AssertionError("Pallas kernel (single step) does not match reference")

    # ---- fused T-step decode (weights VMEM-resident across the grid) ----
    preds, hT, cT = decoder_forward_seq(token_ids, hidden, cell, params)
    jax.block_until_ready((preds, hT, cT))
    h_r, c_r = hidden, cell
    ref_preds = []
    for t in range(T):
        p_r, h_r, c_r = decoder_reference(token_ids[t], h_r, c_r, params)
        ref_preds.append(p_r)
    ref_preds = jnp.stack(ref_preds)
    for a, b in ((preds, ref_preds), (hT, h_r), (cT, c_r)):
        if not jnp.allclose(a, b, rtol=5e-2, atol=1e-2):
            raise AssertionError("Pallas kernel (multi-step) does not match reference")

    print("KERNEL_OK")
</pallas_src>

<mosaic_0001>
module attributes {stable_mosaic.version = 11 : i64} {
  func.func @decoder_kernel(%arg0: i32, %arg1: memref<1x8xi32, #tpu.memory_space<smem>>, %arg2: memref<2x8x128xf32, #tpu.memory_space<vmem>>, %arg3: memref<2x8x128xf32, #tpu.memory_space<vmem>>, %arg4: memref<256x128xbf16, #tpu.memory_space<vmem>>, %arg5: memref<2x256x512xbf16, #tpu.memory_space<vmem>>, %arg6: memref<2x1x512xf32, #tpu.memory_space<vmem>>, %arg7: memref<128x256xbf16, #tpu.memory_space<vmem>>, %arg8: memref<1x256xf32, #tpu.memory_space<vmem>>, %arg9: memref<1x8x256xf32, #tpu.memory_space<vmem>>, %arg10: memref<2x8x128xf32, #tpu.memory_space<vmem>>, %arg11: memref<2x8x128xf32, #tpu.memory_space<vmem>>, %arg12: memref<8x256xbf16, #tpu.memory_space<vmem>>) attributes {dimension_semantics = [#tpu.dimension_semantics<arbitrary>], iteration_bounds = array<i64: 1>, scalar_prefetch = 0 : i64, scratch_operands = 1 : i64, tpu.core_type = #tpu.core_type<tc>, window_params = [{transform_indices = @transform_0, window_bounds = array<i64: 1, 8>}, {pipeline_mode = #tpu.pipeline_mode<synchronous>, transform_indices = @transform_1, window_bounds = array<i64: 2, 8, 128>}, {pipeline_mode = #tpu.pipeline_mode<synchronous>, transform_indices = @transform_2, window_bounds = array<i64: 2, 8, 128>}, {pipeline_mode = #tpu.pipeline_mode<synchronous>, transform_indices = @transform_3, window_bounds = array<i64: 256, 128>}, {pipeline_mode = #tpu.pipeline_mode<synchronous>, transform_indices = @transform_4, window_bounds = array<i64: 2, 256, 512>}, {pipeline_mode = #tpu.pipeline_mode<synchronous>, transform_indices = @transform_5, window_bounds = array<i64: 2, 1, 512>}, {pipeline_mode = #tpu.pipeline_mode<synchronous>, transform_indices = @transform_6, window_bounds = array<i64: 128, 256>}, {pipeline_mode = #tpu.pipeline_mode<synchronous>, transform_indices = @transform_7, window_bounds = array<i64: 1, 256>}, {transform_indices = @transform_8, window_bounds = array<i64: 1, 8, 256>}, {pipeline_mode = #tpu.pipeline_mode<synchronous>, transform_indices = @transform_9, window_bounds = array<i64: 2, 8, 128>}, {pipeline_mode = #tpu.pipeline_mode<synchronous>, transform_indices = @transform_10, window_bounds = array<i64: 2, 8, 128>}]} {
    %c0_i32 = arith.constant 0 : i32
    %0 = arith.cmpi eq, %arg0, %c0_i32 : i32
    %1 = arith.extui %0 : i1 to i32
    %c0_i32_0 = arith.constant 0 : i32
    %2 = arith.cmpi ne, %1, %c0_i32_0 : i32
    scf.if %2 {
      %c0_67 = arith.constant 0 : index
      %c0_68 = arith.constant 0 : index
      %c0_69 = arith.constant 0 : index
      %176 = vector.load %arg2[%c0_67, %c0_68, %c0_69] : memref<2x8x128xf32, #tpu.memory_space<vmem>>, vector<2x8x128xf32>
      %c0_70 = arith.constant 0 : index
      %c0_71 = arith.constant 0 : index
      %c0_72 = arith.constant 0 : index
      %177 = vector.load %arg10[%c0_70, %c0_71, %c0_72] : memref<2x8x128xf32, #tpu.memory_space<vmem>>, vector<2x8x128xf32>
      tpu.vector_store %arg10[%c0_70, %c0_71, %c0_72], %176 {strides = array<i32>} : memref<2x8x128xf32, #tpu.memory_space<vmem>>, vector<2x8x128xf32>,
      %c0_73 = arith.constant 0 : index
      %c0_74 = arith.constant 0 : index
      %c0_75 = arith.constant 0 : index
      %178 = vector.load %arg3[%c0_73, %c0_74, %c0_75] : memref<2x8x128xf32, #tpu.memory_space<vmem>>, vector<2x8x128xf32>
      %c0_76 = arith.constant 0 : index
      %c0_77 = arith.constant 0 : index
      %c0_78 = arith.constant 0 : index
      %179 = vector.load %arg11[%c0_76, %c0_77, %c0_78] : memref<2x8x128xf32, #tpu.memory_space<vmem>>, vector<2x8x128xf32>
      tpu.vector_store %arg11[%c0_76, %c0_77, %c0_78], %178 {strides = array<i32>} : memref<2x8x128xf32, #tpu.memory_space<vmem>>, vector<2x8x128xf32>,
    } else {
    }
    %3 = tpu.iota {dimensions = array<i32: 1>} : vector<8x256xi32>
    %4 = tpu.iota {dimensions = array<i32: 0>} : vector<8x256xi32>
    %c0_i32_1 = arith.constant 0 : i32
    %5 = vector.broadcast %c0_i32_1 : i32 to vector<8x256xi32>
    %6 = arith.cmpi eq, %4, %5 : vector<8x256xi32>
    %7 = arith.index_cast %arg0 : i32 to index
    %c0 = arith.constant 0 : index
    %8 = memref.load %arg1[%7, %c0] : memref<1x8xi32, #tpu.memory_space<smem>>
    %9 = vector.broadcast %8 : i32 to vector<8x256xi32>
    %10 = arith.cmpi eq, %3, %9 : vector<8x256xi32>
    %11 = arith.andi %6, %10 : vector<8x256xi1>
    %c1_i32 = arith.constant 1 : i32
    %12 = vector.broadcast %c1_i32 : i32 to vector<8x256xi32>
    %13 = arith.cmpi eq, %4, %12 : vector<8x256xi32>
    %14 = arith.index_cast %arg0 : i32 to index
    %c1 = arith.constant 1 : index
    %15 = memref.load %arg1[%14, %c1] : memref<1x8xi32, #tpu.memory_space<smem>>
    %16 = vector.broadcast %15 : i32 to vector<8x256xi32>
    %17 = arith.cmpi eq, %3, %16 : vector<8x256xi32>
    %18 = arith.andi %13, %17 : vector<8x256xi1>
    %19 = arith.ori %11, %18 : vector<8x256xi1>
    %c2_i32 = arith.constant 2 : i32
    %20 = vector.broadcast %c2_i32 : i32 to vector<8x256xi32>
    %21 = arith.cmpi eq, %4, %20 : vector<8x256xi32>
    %22 = arith.index_cast %arg0 : i32 to index
    %c2 = arith.constant 2 : index
    %23 = memref.load %arg1[%22, %c2] : memref<1x8xi32, #tpu.memory_space<smem>>
    %24 = vector.broadcast %23 : i32 to vector<8x256xi32>
    %25 = arith.cmpi eq, %3, %24 : vector<8x256xi32>
    %26 = arith.andi %21, %25 : vector<8x256xi1>
    %27 = arith.ori %19, %26 : vector<8x256xi1>
    %c3_i32 = arith.constant 3 : i32
    %28 = vector.broadcast %c3_i32 : i32 to vector<8x256xi32>
    %29 = arith.cmpi eq, %4, %28 : vector<8x256xi32>
    %30 = arith.index_cast %arg0 : i32 to index
    %c3 = arith.constant 3 : index
    %31 = memref.load %arg1[%30, %c3] : memref<1x8xi32, #tpu.memory_space<smem>>
    %32 = vector.broadcast %31 : i32 to vector<8x256xi32>
    %33 = arith.cmpi eq, %3, %32 : vector<8x256xi32>
    %34 = arith.andi %29, %33 : vector<8x256xi1>
    %35 = arith.ori %27, %34 : vector<8x256xi1>
    %c4_i32 = arith.constant 4 : i32
    %36 = vector.broadcast %c4_i32 : i32 to vector<8x256xi32>
    %37 = arith.cmpi eq, %4, %36 : vector<8x256xi32>
    %38 = arith.index_cast %arg0 : i32 to index
    %c4 = arith.constant 4 : index
    %39 = memref.load %arg1[%38, %c4] : memref<1x8xi32, #tpu.memory_space<smem>>
    %40 = vector.broadcast %39 : i32 to vector<8x256xi32>
    %41 = arith.cmpi eq, %3, %40 : vector<8x256xi32>
    %42 = arith.andi %37, %41 : vector<8x256xi1>
    %43 = arith.ori %35, %42 : vector<8x256xi1>
    %c5_i32 = arith.constant 5 : i32
    %44 = vector.broadcast %c5_i32 : i32 to vector<8x256xi32>
    %45 = arith.cmpi eq, %4, %44 : vector<8x256xi32>
    %46 = arith.index_cast %arg0 : i32 to index
    %c5 = arith.constant 5 : index
    %47 = memref.load %arg1[%46, %c5] : memref<1x8xi32, #tpu.memory_space<smem>>
    %48 = vector.broadcast %47 : i32 to vector<8x256xi32>
    %49 = arith.cmpi eq, %3, %48 : vector<8x256xi32>
    %50 = arith.andi %45, %49 : vector<8x256xi1>
    %51 = arith.ori %43, %50 : vector<8x256xi1>
    %c6_i32 = arith.constant 6 : i32
    %52 = vector.broadcast %c6_i32 : i32 to vector<8x256xi32>
    %53 = arith.cmpi eq, %4, %52 : vector<8x256xi32>
    %54 = arith.index_cast %arg0 : i32 to index
    %c6 = arith.constant 6 : index
    %55 = memref.load %arg1[%54, %c6] : memref<1x8xi32, #tpu.memory_space<smem>>
    %56 = vector.broadcast %55 : i32 to vector<8x256xi32>
    %57 = arith.cmpi eq, %3, %56 : vector<8x256xi32>
    %58 = arith.andi %53, %57 : vector<8x256xi1>
    %59 = arith.ori %51, %58 : vector<8x256xi1>
    %c7_i32 = arith.constant 7 : i32
    %60 = vector.broadcast %c7_i32 : i32 to vector<8x256xi32>
    %61 = arith.cmpi eq, %4, %60 : vector<8x256xi32>
    %62 = arith.index_cast %arg0 : i32 to index
    %c7 = arith.constant 7 : index
    %63 = memref.load %arg1[%62, %c7] : memref<1x8xi32, #tpu.memory_space<smem>>
    %64 = vector.broadcast %63 : i32 to vector<8x256xi32>
    %65 = arith.cmpi eq, %3, %64 : vector<8x256xi32>
    %66 = arith.andi %61, %65 : vector<8x256xi1>
    %67 = arith.ori %59, %66 : vector<8x256xi1>
    %68 = arith.extui %67 : vector<8x256xi1> to vector<8x256xi32>
    %69 = arith.sitofp %68 : vector<8x256xi32> to vector<8x256xf32>
    %70 = arith.truncf %69 : vector<8x256xf32> to vector<8x256xbf16>
    %c0_2 = arith.constant 0 : index
    %c0_3 = arith.constant 0 : index
    %71 = vector.load %arg4[%c0_2, %c0_3] : memref<256x128xbf16, #tpu.memory_space<vmem>>, vector<256x128xbf16>
    %cst = arith.constant dense<0.000000e+00> : vector<8x128xf32>
    %72 = tpu.matmul %70, %71, %cst {dimension_numbers = #tpu.dot_dimension_numbers<[1], [0], [0], [1], [0, 0, 1, 1], [], []>} : vector<8x256xbf16>, vector<256x128xbf16>, vector<8x128xf32> -> vector<8x128xf32>
    %c0_4 = arith.constant 0 : index
    %c0_5 = arith.constant 0 : index
    %c0_6 = arith.constant 0 : index
    %73 = vector.load %arg10[%c0_4, %c0_5, %c0_6] : memref<2x8x128xf32, #tpu.memory_space<vmem>>, vector<1x8x128xf32>
    %74 = vector.shape_cast %73 : vector<1x8x128xf32> to vector<8x128xf32>
    %c0_7 = arith.constant 0 : index
    %c0_8 = arith.constant 0 : index
    %c0_9 = arith.constant 0 : index
    %75 = vector.load %arg11[%c0_7, %c0_8, %c0_9] : memref<2x8x128xf32, #tpu.memory_space<vmem>>, vector<1x8x128xf32>
    %76 = vector.shape_cast %75 : vector<1x8x128xf32> to vector<8x128xf32>
    %77 = arith.truncf %72 : vector<8x128xf32> to vector<8x128xbf16>
    %c0_10 = arith.constant 0 : index
    %c0_11 = arith.constant 0 : index
    %78 = vector.load %arg12[%c0_10, %c0_11] : memref<8x256xbf16, #tpu.memory_space<vmem>>, vector<8x128xbf16>
    tpu.vector_store %arg12[%c0_10, %c0_11], %77 {strides = array<i32>} : memref<8x256xbf16, #tpu.memory_space<vmem>>, vector<8x128xbf16>,
    %79 = arith.truncf %74 : vector<8x128xf32> to vector<8x128xbf16>
    %c0_12 = arith.constant 0 : index
    %c128 = arith.constant 128 : index
    %80 = vector.load %arg12[%c0_12, %c128] : memref<8x256xbf16, #tpu.memory_space<vmem>>, vector<8x128xbf16>
    tpu.vector_store %arg12[%c0_12, %c128], %79 {strides = array<i32>} : memref<8x256xbf16, #tpu.memory_space<vmem>>, vector<8x128xbf16>,
    %c0_13 = arith.constant 0 : index
    %c0_14 = arith.constant 0 : index
    %81 = vector.load %arg12[%c0_13, %c0_14] : memref<8x256xbf16, #tpu.memory_space<vmem>>, vector<8x256xbf16>
    %c0_15 = arith.constant 0 : index
    %c0_16 = arith.constant 0 : index
    %c0_17 = arith.constant 0 : index
    %82 = vector.load %arg5[%c0_15, %c0_16, %c0_17] : memref<2x256x512xbf16, #tpu.memory_space<vmem>>, vector<1x256x512xbf16>
    %83 = vector.shape_cast %82 : vector<1x256x512xbf16> to vector<256x512xbf16>
    %cst_18 = arith.constant dense<0.000000e+00> : vector<8x512xf32>
    %84 = tpu.matmul %81, %83, %cst_18 {dimension_numbers = #tpu.dot_dimension_numbers<[1], [0], [0], [1], [0, 0, 1, 1], [], []>} : vector<8x256xbf16>, vector<256x512xbf16>, vector<8x512xf32> -> vector<8x512xf32>
    %c0_19 = arith.constant 0 : index
    %c0_20 = arith.constant 0 : index
    %c0_21 = arith.constant 0 : index
    %85 = vector.load %arg6[%c0_19, %c0_20, %c0_21] : memref<2x1x512xf32, #tpu.memory_space<vmem>>, vector<1x1x512xf32>
    %86 = vector.shape_cast %85 : vector<1x1x512xf32> to vector<1x512xf32>
    %87 = vector.broadcast %86 : vector<1x512xf32> to vector<8x512xf32>
    %88 = arith.addf %84, %87 : vector<8x512xf32>
    %89 = vector.extract_strided_slice %88 {offsets = [0, 0], sizes = [8, 128], strides = [1, 1]} : vector<8x512xf32> to vector<8x128xf32>
    %90 = arith.negf %89 : vector<8x128xf32>
    %91 = math.exp %90 : vector<8x128xf32>
    %cst_22 = arith.constant 1.000000e+00 : f32
    %92 = vector.broadcast %cst_22 : f32 to vector<8x128xf32>
    %93 = arith.addf %92, %91 : vector<8x128xf32>
    %94 = arith.divf %92, %93 : vector<8x128xf32>
    %95 = vector.extract_strided_slice %88 {offsets = [0, 128], sizes = [8, 128], strides = [1, 1]} : vector<8x512xf32> to vector<8x128xf32>
    %96 = arith.negf %95 : vector<8x128xf32>
    %97 = math.exp %96 : vector<8x128xf32>
    %cst_23 = arith.constant 1.000000e+00 : f32
    %98 = vector.broadcast %cst_23 : f32 to vector<8x128xf32>
    %99 = arith.addf %98, %97 : vector<8x128xf32>
    %100 = arith.divf %98, %99 : vector<8x128xf32>
    %101 = vector.extract_strided_slice %88 {offsets = [0, 256], sizes = [8, 128], strides = [1, 1]} : vector<8x512xf32> to vector<8x128xf32>
    %102 = math.tanh %101 : vector<8x128xf32>
    %103 = vector.extract_strided_slice %88 {offsets = [0, 384], sizes = [8, 128], strides = [1, 1]} : vector<8x512xf32> to vector<8x128xf32>
    %104 = arith.negf %103 : vector<8x128xf32>
    %105 = math.exp %104 : vector<8x128xf32>
    %cst_24 = arith.constant 1.000000e+00 : f32
    %106 = vector.broadcast %cst_24 : f32 to vector<8x128xf32>
    %107 = arith.addf %106, %105 : vector<8x128xf32>
    %108 = arith.divf %106, %107 : vector<8x128xf32>
    %109 = arith.mulf %100, %76 : vector<8x128xf32>
    %110 = arith.mulf %94, %102 : vector<8x128xf32>
    %111 = arith.addf %109, %110 : vector<8x128xf32>
    %112 = math.tanh %111 : vector<8x128xf32>
    %113 = arith.mulf %108, %112 : vector<8x128xf32>
    %c0_25 = arith.constant 0 : index
    %c0_26 = arith.constant 0 : index
    %c0_27 = arith.constant 0 : index
    %114 = vector.load %arg10[%c0_25, %c0_26, %c0_27] : memref<2x8x128xf32, #tpu.memory_space<vmem>>, vector<1x8x128xf32>
    %115 = vector.shape_cast %114 : vector<1x8x128xf32> to vector<8x128xf32>
    %116 = vector.shape_cast %113 : vector<8x128xf32> to vector<1x8x128xf32>
    tpu.vector_store %arg10[%c0_25, %c0_26, %c0_27], %116 {strides = array<i32>} : memref<2x8x128xf32, #tpu.memory_space<vmem>>, vector<1x8x128xf32>,
    %c0_28 = arith.constant 0 : index
    %c0_29 = arith.constant 0 : index
    %c0_30 = arith.constant 0 : index
    %117 = vector.load %arg11[%c0_28, %c0_29, %c0_30] : memref<2x8x128xf32, #tpu.memory_space<vmem>>, vector<1x8x128xf32>
    %118 = vector.shape_cast %117 : vector<1x8x128xf32> to vector<8x128xf32>
    %119 = vector.shape_cast %111 : vector<8x128xf32> to vector<1x8x128xf32>
    tpu.vector_store %arg11[%c0_28, %c0_29, %c0_30], %119 {strides = array<i32>} : memref<2x8x128xf32, #tpu.memory_space<vmem>>, vector<1x8x128xf32>,
    %c1_31 = arith.constant 1 : index
    %c0_32 = arith.constant 0 : index
    %c0_33 = arith.constant 0 : index
    %120 = vector.load %arg10[%c1_31, %c0_32, %c0_33] : memref<2x8x128xf32, #tpu.memory_space<vmem>>, vector<1x8x128xf32>
    %121 = vector.shape_cast %120 : vector<1x8x128xf32> to vector<8x128xf32>
    %c1_34 = arith.constant 1 : index
    %c0_35 = arith.constant 0 : index
    %c0_36 = arith.constant 0 : index
    %122 = vector.load %arg11[%c1_34, %c0_35, %c0_36] : memref<2x8x128xf32, #tpu.memory_space<vmem>>, vector<1x8x128xf32>
    %123 = vector.shape_cast %122 : vector<1x8x128xf32> to vector<8x128xf32>
    %124 = arith.truncf %113 : vector<8x128xf32> to vector<8x128xbf16>
    %c0_37 = arith.constant 0 : index
    %c0_38 = arith.constant 0 : index
    %125 = vector.load %arg12[%c0_37, %c0_38] : memref<8x256xbf16, #tpu.memory_space<vmem>>, vector<8x128xbf16>
    tpu.vector_store %arg12[%c0_37, %c0_38], %124 {strides = array<i32>} : memref<8x256xbf16, #tpu.memory_space<vmem>>, vector<8x128xbf16>,
    %126 = arith.truncf %121 : vector<8x128xf32> to vector<8x128xbf16>
    %c0_39 = arith.constant 0 : index
    %c128_40 = arith.constant 128 : index
    %127 = vector.load %arg12[%c0_39, %c128_40] : memref<8x256xbf16, #tpu.memory_space<vmem>>, vector<8x128xbf16>
    tpu.vector_store %arg12[%c0_39, %c128_40], %126 {strides = array<i32>} : memref<8x256xbf16, #tpu.memory_space<vmem>>, vector<8x128xbf16>,
    %c0_41 = arith.constant 0 : index
    %c0_42 = arith.constant 0 : index
    %128 = vector.load %arg12[%c0_41, %c0_42] : memref<8x256xbf16, #tpu.memory_space<vmem>>, vector<8x256xbf16>
    %c1_43 = arith.constant 1 : index
    %c0_44 = arith.constant 0 : index
    %c0_45 = arith.constant 0 : index
    %129 = vector.load %arg5[%c1_43, %c0_44, %c0_45] : memref<2x256x512xbf16, #tpu.memory_space<vmem>>, vector<1x256x512xbf16>
    %130 = vector.shape_cast %129 : vector<1x256x512xbf16> to vector<256x512xbf16>
    %cst_46 = arith.constant dense<0.000000e+00> : vector<8x512xf32>
    %131 = tpu.matmul %128, %130, %cst_46 {dimension_numbers = #tpu.dot_dimension_numbers<[1], [0], [0], [1], [0, 0, 1, 1], [], []>} : vector<8x256xbf16>, vector<256x512xbf16>, vector<8x512xf32> -> vector<8x512xf32>
    %c1_47 = arith.constant 1 : index
    %c0_48 = arith.constant 0 : index
    %c0_49 = arith.constant 0 : index
    %132 = vector.load %arg6[%c1_47, %c0_48, %c0_49] : memref<2x1x512xf32, #tpu.memory_space<vmem>>, vector<1x1x512xf32>
    %133 = vector.shape_cast %132 : vector<1x1x512xf32> to vector<1x512xf32>
    %134 = vector.broadcast %133 : vector<1x512xf32> to vector<8x512xf32>
    %135 = arith.addf %131, %134 : vector<8x512xf32>
    %136 = vector.extract_strided_slice %135 {offsets = [0, 0], sizes = [8, 128], strides = [1, 1]} : vector<8x512xf32> to vector<8x128xf32>
    %137 = arith.negf %136 : vector<8x128xf32>
    %138 = math.exp %137 : vector<8x128xf32>
    %cst_50 = arith.constant 1.000000e+00 : f32
    %139 = vector.broadcast %cst_50 : f32 to vector<8x128xf32>
    %140 = arith.addf %139, %138 : vector<8x128xf32>
    %141 = arith.divf %139, %140 : vector<8x128xf32>
    %142 = vector.extract_strided_slice %135 {offsets = [0, 128], sizes = [8, 128], strides = [1, 1]} : vector<8x512xf32> to vector<8x128xf32>
    %143 = arith.negf %142 : vector<8x128xf32>
    %144 = math.exp %143 : vector<8x128xf32>
    %cst_51 = arith.constant 1.000000e+00 : f32
    %145 = vector.broadcast %cst_51 : f32 to vector<8x128xf32>
    %146 = arith.addf %145, %144 : vector<8x128xf32>
    %147 = arith.divf %145, %146 : vector<8x128xf32>
    %148 = vector.extract_strided_slice %135 {offsets = [0, 256], sizes = [8, 128], strides = [1, 1]} : vector<8x512xf32> to vector<8x128xf32>
    %149 = math.tanh %148 : vector<8x128xf32>
    %150 = vector.extract_strided_slice %135 {offsets = [0, 384], sizes = [8, 128], strides = [1, 1]} : vector<8x512xf32> to vector<8x128xf32>
    %151 = arith.negf %150 : vector<8x128xf32>
    %152 = math.exp %151 : vector<8x128xf32>
    %cst_52 = arith.constant 1.000000e+00 : f32
    %153 = vector.broadcast %cst_52 : f32 to vector<8x128xf32>
    %154 = arith.addf %153, %152 : vector<8x128xf32>
    %155 = arith.divf %153, %154 : vector<8x128xf32>
    %156 = arith.mulf %147, %123 : vector<8x128xf32>
    %157 = arith.mulf %141, %149 : vector<8x128xf32>
    %158 = arith.addf %156, %157 : vector<8x128xf32>
    %159 = math.tanh %158 : vector<8x128xf32>
    %160 = arith.mulf %155, %159 : vector<8x128xf32>
    %c1_53 = arith.constant 1 : index
    %c0_54 = arith.constant 0 : index
    %c0_55 = arith.constant 0 : index
    %161 = vector.load %arg10[%c1_53, %c0_54, %c0_55] : memref<2x8x128xf32, #tpu.memory_space<vmem>>, vector<1x8x128xf32>
    %162 = vector.shape_cast %161 : vector<1x8x128xf32> to vector<8x128xf32>
    %163 = vector.shape_cast %160 : vector<8x128xf32> to vector<1x8x128xf32>
    tpu.vector_store %arg10[%c1_53, %c0_54, %c0_55], %163 {strides = array<i32>} : memref<2x8x128xf32, #tpu.memory_space<vmem>>, vector<1x8x128xf32>,
    %c1_56 = arith.constant 1 : index
    %c0_57 = arith.constant 0 : index
    %c0_58 = arith.constant 0 : index
    %164 = vector.load %arg11[%c1_56, %c0_57, %c0_58] : memref<2x8x128xf32, #tpu.memory_space<vmem>>, vector<1x8x128xf32>
    %165 = vector.shape_cast %164 : vector<1x8x128xf32> to vector<8x128xf32>
    %166 = vector.shape_cast %158 : vector<8x128xf32> to vector<1x8x128xf32>
    tpu.vector_store %arg11[%c1_56, %c0_57, %c0_58], %166 {strides = array<i32>} : memref<2x8x128xf32, #tpu.memory_space<vmem>>, vector<1x8x128xf32>,
    %167 = arith.truncf %160 : vector<8x128xf32> to vector<8x128xbf16>
    %c0_59 = arith.constant 0 : index
    %c0_60 = arith.constant 0 : index
    %168 = vector.load %arg7[%c0_59, %c0_60] : memref<128x256xbf16, #tpu.memory_space<vmem>>, vector<128x256xbf16>
    %cst_61 = arith.constant dense<0.000000e+00> : vector<8x256xf32>
    %169 = tpu.matmul %167, %168, %cst_61 {dimension_numbers = #tpu.dot_dimension_numbers<[1], [0], [0], [1], [0, 0, 1, 1], [], []>} : vector<8x128xbf16>, vector<128x256xbf16>, vector<8x256xf32> -> vector<8x256xf32>
    %c0_62 = arith.constant 0 : index
    %c0_63 = arith.constant 0 : index
    %170 = vector.load %arg8[%c0_62, %c0_63] : memref<1x256xf32, #tpu.memory_space<vmem>>, vector<1x256xf32>
    %171 = vector.broadcast %170 : vector<1x256xf32> to vector<8x256xf32>
    %172 = arith.addf %169, %171 : vector<8x256xf32>
    %c0_64 = arith.constant 0 : index
    %c0_65 = arith.constant 0 : index
    %c0_66 = arith.constant 0 : index
    %173 = vector.load %arg9[%c0_64, %c0_65, %c0_66] : memref<1x8x256xf32, #tpu.memory_space<vmem>>, vector<1x8x256xf32>
    %174 = vector.shape_cast %173 : vector<1x8x256xf32> to vector<8x256xf32>
    %175 = vector.shape_cast %172 : vector<8x256xf32> to vector<1x8x256xf32>
    tpu.vector_store %arg9[%c0_64, %c0_65, %c0_66], %175 {strides = array<i32>} : memref<1x8x256xf32, #tpu.memory_space<vmem>>, vector<1x8x256xf32>,
    return
  }
  func.func @transform_0(%arg0: i32) -> (i32, i32) {
    %c0_i32 = arith.constant 0 : i32
    %c0_i32_0 = arith.constant 0 : i32
    %c0_i32_1 = arith.constant 0 : i32
    return %c0_i32, %c0_i32_0 : i32, i32
  }
  func.func @transform_1(%arg0: i32) -> (i32, i32, i32) {
    %c0_i32 = arith.constant 0 : i32
    %c0_i32_0 = arith.constant 0 : i32
    %c0_i32_1 = arith.constant 0 : i32
    %c0_i32_2 = arith.constant 0 : i32
    return %c0_i32, %c0_i32_0, %c0_i32_1 : i32, i32, i32
  }
  func.func @transform_2(%arg0: i32) -> (i32, i32, i32) {
    %c0_i32 = arith.constant 0 : i32
    %c0_i32_0 = arith.constant 0 : i32
    %c0_i32_1 = arith.constant 0 : i32
    %c0_i32_2 = arith.constant 0 : i32
    return %c0_i32, %c0_i32_0, %c0_i32_1 : i32, i32, i32
  }
  func.func @transform_3(%arg0: i32) -> (i32, i32) {
    %c0_i32 = arith.constant 0 : i32
    %c0_i32_0 = arith.constant 0 : i32
    %c0_i32_1 = arith.constant 0 : i32
    return %c0_i32, %c0_i32_0 : i32, i32
  }
  func.func @transform_4(%arg0: i32) -> (i32, i32, i32) {
    %c0_i32 = arith.constant 0 : i32
    %c0_i32_0 = arith.constant 0 : i32
    %c0_i32_1 = arith.constant 0 : i32
    %c0_i32_2 = arith.constant 0 : i32
    return %c0_i32, %c0_i32_0, %c0_i32_1 : i32, i32, i32
  }
  func.func @transform_5(%arg0: i32) -> (i32, i32, i32) {
    %c0_i32 = arith.constant 0 : i32
    %c0_i32_0 = arith.constant 0 : i32
    %c0_i32_1 = arith.constant 0 : i32
    %c0_i32_2 = arith.constant 0 : i32
    return %c0_i32, %c0_i32_0, %c0_i32_1 : i32, i32, i32
  }
  func.func @transform_6(%arg0: i32) -> (i32, i32) {
    %c0_i32 = arith.constant 0 : i32
    %c0_i32_0 = arith.constant 0 : i32
    %c0_i32_1 = arith.constant 0 : i32
    return %c0_i32, %c0_i32_0 : i32, i32
  }
  func.func @transform_7(%arg0: i32) -> (i32, i32) {
    %c0_i32 = arith.constant 0 : i32
    %c0_i32_0 = arith.constant 0 : i32
    %c0_i32_1 = arith.constant 0 : i32
    return %c0_i32, %c0_i32_0 : i32, i32
  }
  func.func @transform_8(%arg0: i32) -> (i32, i32, i32) {
    %c0_i32 = arith.constant 0 : i32
    %c0_i32_0 = arith.constant 0 : i32
    %c0_i32_1 = arith.constant 0 : i32
    return %arg0, %c0_i32, %c0_i32_0 : i32, i32, i32
  }
  func.func @transform_9(%arg0: i32) -> (i32, i32, i32) {
    %c0_i32 = arith.constant 0 : i32
    %c0_i32_0 = arith.constant 0 : i32
    %c0_i32_1 = arith.constant 0 : i32
    %c0_i32_2 = arith.constant 0 : i32
    return %c0_i32, %c0_i32_0, %c0_i32_1 : i32, i32, i32
  }
  func.func @transform_10(%arg0: i32) -> (i32, i32, i32) {
    %c0_i32 = arith.constant 0 : i32
    %c0_i32_0 = arith.constant 0 : i32
    %c0_i32_1 = arith.constant 0 : i32
    %c0_i32_2 = arith.constant 0 : i32
    return %c0_i32, %c0_i32_0, %c0_i32_1 : i32, i32, i32
  }
}

</mosaic_0001>

<bundles_post_ra>
// kernel: _decode_pallas.1
= control target key start
LH: loop header
LB: loop body
LE: loop exit
PB: predicated region body
PF: predicated region fallthrough
CT: control target
= control target key end

     0   :  { %16 = vsyncpa [#allocation6], 0  ;;  %s3285_s0 = inlined_call_operand.vmem [shape: s32[1,8], index: 0, kind: input, shape index: {}]   ;;  %s3286_s1 = inlined_call_operand.hbm [shape: f32[2,8,128], index: 1, kind: input, shape index: {}, may-alias: {1,9}]   ;;  %s3287_s2 = inlined_call_operand.hbm [shape: f32[2,8,128], index: 2, kind: input, shape index: {}, may-alias: {2,10}]   ;;  %s3288_s3 = inlined_call_operand.hbm [shape: bf16[256,128], index: 3, kind: input, shape index: {}]   ;;  %s3289_s4 = inlined_call_operand.hbm [shape: bf16[2,256,512], index: 4, kind: input, shape index: {}]   ;;  %s3290_s5 = inlined_call_operand.vmem [shape: f32[2,1,512], index: 5, kind: input, shape index: {}]   ;;  %s3291_s6 = inlined_call_operand.hbm [shape: bf16[128,256], index: 6, kind: input, shape index: {}]   ;;  %s3292_s7 = inlined_call_operand.vmem [shape: f32[1,256], index: 7, kind: input, shape index: {}]   ;;  %s3293_s8 = inlined_call_operand.hbm [shape: f32[1,8,256], index: 8, kind: output, shape index: {0}]   ;;  %s3294_s9 = inlined_call_operand.hbm [shape: f32[2,8,128], index: 9, kind: output, shape index: {1}, may-alias: {1,9}]   ;;  %s3295_s10 = inlined_call_operand.hbm [shape: f32[2,8,128], index: 10, kind: output, shape index: {2}, may-alias: {2,10}]  }
   0x1   :  { %17 = vsyncpa [#allocation4], 0 }
   0x2   :  { %18 = vsyncpa [#allocation9], 0 }
   0x3   :  { %19 = vsyncpa [#allocation12], 0 }
   0x4   :  { %20 = vsyncpa [#allocation5], 0 }
   0x5   :  { %21 = vsyncpa [#allocation16], 0  ;;  %s48_s15 = sshll.u32 %s3287_s2, 4  ;;  %s2814_s16 = smov [#allocation8]   ;;  %s49_s15 = int_to_ptr.hbm [resolvable:$true] %s48_s15 }
   0x6   :  { %s50_s17 = sshll.u32 %s2814_s16, 4  ;;  %s74_s20 = sshll.u32 %s3289_s4, 4  ;;  %s51_s17 = int_to_ptr.vmem [resolvable:$true] %s50_s17  ;;  %s75_s20 = int_to_ptr.hbm [resolvable:$true] %s74_s20 }
   0x7   :  { %s2815_s21 = smov 128   ;;  %s2816_s22 = smov 8  }
   0x8   :  { %56 = dma.hbm_to_vmem [thread:$0]  %s49_s15, 256, %s51_s17, [#allocation9], %s2815_s21, %s2815_s21, %s2816_s22  }
   0x9   :  { %s2817_s23 = smov [#allocation11]   ;;  %s2818_s25 = smov 256  }
   0xa   :  { %s76_s24 = sshll.u32 %s2817_s23, 4  ;;  %s2819_s2 = smov 16   ;;  %s77_s24 = int_to_ptr.vmem [resolvable:$true] %s76_s24 }
   0xb   :  { %82 = dma.hbm_to_vmem [thread:$0]  %s75_s20, 16384, %s77_s24, [#allocation12], %s2818_s25, %s2818_s25, %s2819_s2  }
   0xc   :  { %s27_s28 = sshll.u32 %s3285_s0, 4  ;;  %s35_s30 = sshll.u32 %s3286_s1, 4  ;;  %s28_s28 = int_to_ptr.vmem [resolvable:$true] %s27_s28  ;;  %s36_s30 = int_to_ptr.hbm [resolvable:$true] %s35_s30 }
   0xd   :  { %s2820_s11 = smov [#allocation3]   ;;  %s2821_s12 = smov [#allocation7]  }
   0xe   :  { %30 = dma.vmem_to_smem %s28_s28, 16, %s2820_s11, [#allocation6]  }
   0xf   :  { %s37_s13 = sshll.u32 %s2821_s12, 4  ;;  %s61_s16 = sshll.u32 %s3288_s3, 4  ;;  %s38_s13 = int_to_ptr.vmem [resolvable:$true] %s37_s13  ;;  %s62_s16 = int_to_ptr.hbm [resolvable:$true] %s61_s16 }
  0x10   :  { %43 = dma.hbm_to_vmem [thread:$0]  %s36_s30, 256, %s38_s13, [#allocation4], %s2815_s21, %s2815_s21, %s2816_s22  }
  0x11   :  { %s2822_s0 = smov [#allocation10]   ;;  %s89_s19 = sshll.u32 %s3291_s6, 4  ;;  %s90_s19 = int_to_ptr.hbm [resolvable:$true] %s89_s19 }
  0x12   :  { %s63_s17 = sshll.u32 %s2822_s0, 4  ;;  %s2823_s20 = smov 64   ;;  %s64_s17 = int_to_ptr.vmem [resolvable:$true] %s63_s17 }
  0x13   :  { %s2824_s23 = smov 4   ;;  %s2825_s24 = smov [#allocation13]  }
  0x14   :  { %69 = dma.hbm_to_vmem [thread:$0]  %s62_s16, 2048, %s64_s17, [#allocation9], %s2823_s20, %s2823_s20, %s2824_s23  }
  0x15   :  { %s91_s25 = sshll.u32 %s2825_s24, 4  ;;  %s92_s25 = int_to_ptr.vmem [resolvable:$true] %s91_s25 }
  0x16   :  { %97 = dma.hbm_to_vmem [thread:$0]  %s90_s19, 2048, %s92_s25, [#allocation12], %s2815_s21, %s2815_s21, %s2816_s22  }
  0x17   :  { %2802 = dma.done.wait [#allocation6], 16  }
  0x18   :  { %2803 = vsyncadd [#allocation6], 4294967280 }
  0x19   :  { %2804 = dma.done.wait [#allocation4], 256  }
  0x1a   :  { %2805 = vsyncadd [#allocation4], 4294967040 }
  0x1b   :  { %2806 = dma.done.wait [#allocation9], 2304  }
  0x1c   :  { %2807 = vsyncadd [#allocation9], 4294964992 }
  0x1d   :  { %2808 = dma.done.wait [#allocation12], 18432  }
  0x1e   :  { %2809 = vsyncadd [#allocation12], 4294948864 }
  0x1f   :  { %124 = sfence }
  0x20   :  { %v2387_v0 = vld [vmem:[#allocation10 + $0x38] sm:$0xff]  ;;  %v137_v2 = vlaneseq  ;;  %s2912_s3 = sld [smem:[#allocation3]]  ;;  %v2386_v3 = vld [vmem:[#allocation10 + $0x30] sm:$0xff]  ;;  %v2385_v7 = vld [vmem:[#allocation10 + $0x28] sm:$0xff]  ;;  %s1686_s15 = sshll.u32 %s3294_s9, 4  ;;  %s1687_s15 = int_to_ptr.hbm [resolvable:$true] %s1686_s15 }
  0x21   :  { %v2395_v1 = vld [vmem:[#allocation10 + $0x78] sm:$0xff]  ;;  %s2914_s6 = sld [smem:[#allocation3 + $0x1]]  ;;  %354 = vmatpush.bf16.msra.mxu0 %v2387_v0  ;;  %v2394_v4 = vld [vmem:[#allocation10 + $0x70] sm:$0xff]  ;;  %v2393_v8 = vld [vmem:[#allocation10 + $0x68] sm:$0xff]  ;;  %s2827_s16 = smov [#allocation15]  }
  0x22   :  { %367 = vmatpush.bf16.msra.mxu1 %v2395_v1  ;;  %v2916_v5 = vshrl.u32 %v137_v2, 7  ;;  %s2918_s2 = sld [smem:[#allocation3 + $0x2]]  ;;  %v2920_v6 = vand.u32 127, %v137_v2  ;;  %v2384_v11 = vld [vmem:[#allocation10 + $0x20] sm:$0xff]  ;;  %v2426_v17 = vld [vmem:[#allocation11 + $0xec] sm:$0xf0] }
  0x23   :  { %s2923_s26 = sld [smem:[#allocation3 + $0x3]]  ;;  %v2392_v12 = vld [vmem:[#allocation10 + $0x60] sm:$0xff]  ;;  %v2458_v20 = vld [vmem:[#allocation11 + $0x1ec] sm:$0xf0]  ;;  %v2383_v23 = vld [vmem:[#allocation10 + $0x18] sm:$0xff]  ;;  %s1684_s0 = sshll.u32 %s2827_s16, 4  ;;  %s1685_s0 = int_to_ptr.vmem [resolvable:$true] %s1684_s0 }
  0x24   :  { %vm142_vm0 = vcmp.eq.s32.totalorder %v2916_v5, 0  ;;  %vm150_vm1 = vcmp.eq.s32.totalorder %v2916_v5, 1  ;;  %s2927_s27 = sld [smem:[#allocation3 + $0x4]]  ;;  %vm160_vm5 = vcmp.eq.s32.totalorder %v2916_v5, 2  ;;  %v1911_v16 = vld [vmem:[#allocation11 + $0xe0] sm:$0xf] }
  0x25   :  { %355 = vmatpush.bf16.msra.mxu0 %v2386_v3  ;;  %s2933_s28 = sld [smem:[#allocation3 + $0x5]]  ;;  %vm170_vm9 = vcmp.eq.s32.totalorder %v2916_v5, 3  ;;  %v1912_v18 = vor.u32 %v2426_v17, %v1911_v16  ;;  %v2039_v19 = vld [vmem:[#allocation11 + $0x1e0] sm:$0xf]  ;;  %v2391_v24 = vld [vmem:[#allocation10 + $0x58] sm:$0xff]  ;;  %vm180_vm13 = vcmp.eq.s32.totalorder %v2916_v5, 4 }
  0x26   :  { %368 = vmatpush.bf16.msra.mxu1 %v2394_v4  ;;  %v145_v9 = vstv %s2912_s3  ;;  %s2945_s29 = sld [smem:[#allocation3 + $0x6]]  ;;  %v2040_v22 = vor.u32 %v2458_v20, %v2039_v19  ;;  %v1895_v29 = vld [vmem:[#allocation11 + $0xc0] sm:$0xf]  ;;  %v2422_v30 = vld [vmem:[#allocation11 + $0xcc] sm:$0xf0]  ;;  %v3015_v42 = vadd.s32 128, %v2920_v6 }
  0x27   :  { %vm146_vm2 = vcmp.eq.s32.totalorder %v2920_v6, %v145_v9  ;;  %v153_v10 = vstv %s2914_s6  ;;  %s2954_s4 = sld [smem:[#allocation3 + $0x7]]  ;;  %788 = vmatpush.bf16.msra.mxu2 %v1912_v18  ;;  %v1896_v33 = vor.u32 %v2422_v30, %v1895_v29  ;;  %v2023_v34 = vld [vmem:[#allocation11 + $0x1c0] sm:$0xf]  ;;  %v2454_v35 = vld [vmem:[#allocation11 + $0x1cc] sm:$0xf0]  ;;  %v2381_v50 = vld [vmem:[#allocation10 + $0x8] sm:$0xff] }
  0x28   :  { %vm2937_vm3 = vmand %vm142_vm0, %vm146_vm2  ;;  %vm154_vm4 = vcmp.eq.s32.totalorder %v2920_v6, %v153_v10  ;;  %v163_v15 = vstv %s2918_s2  ;;  %801 = vmatpush.bf16.msra.mxu3 %v2040_v22  ;;  %v2024_v37 = vor.u32 %v2454_v35, %v2023_v34  ;;  %v2382_v38 = vld [vmem:[#allocation10 + $0x10] sm:$0xff]  ;;  %v1879_v44 = vld [vmem:[#allocation11 + $0xa0] sm:$0xf]  ;;  %s2828_s17 = smov [#allocation17]   ;;  %s1699_s20 = sshll.u32 %s3295_s10, 4  ;;  %s1700_s20 = int_to_ptr.hbm [resolvable:$true] %s1699_s20 }
  0x29   :  { %vm2949_vm6 = vmand %vm150_vm1, %vm154_vm4  ;;  %356 = vmatpush.bf16.msra.mxu0 %v2385_v7  ;;  %vm164_vm8 = vcmp.eq.s32.totalorder %v2920_v6, %v163_v15  ;;  %v173_v21 = vstv %s2923_s26  ;;  %v2390_v39 = vld [vmem:[#allocation10 + $0x50] sm:$0xff]  ;;  %v2007_v47 = vld [vmem:[#allocation11 + $0x1a0] sm:$0xf]  ;;  %s1697_s18 = sshll.u32 %s2828_s17, 4  ;;  %s2829_s24 = smov [#allocation14]   ;;  %s1698_s18 = int_to_ptr.vmem [resolvable:$true] %s1697_s18 }
  0x2a   :  { %369 = vmatpush.bf16.msra.mxu1 %v2393_v8  ;;  %vm158_vm7 = vmor %vm2937_vm3, %vm2949_vm6  ;;  %vm174_vm12 = vcmp.eq.s32.totalorder %v2920_v6, %v173_v21  ;;  %v183_v26 = vstv %s2927_s27  ;;  %vm190_vm3 = vcmp.eq.s32.totalorder %v2916_v5, 5  ;;  %v2418_v45 = vld [vmem:[#allocation11 + $0xac] sm:$0xf0]  ;;  %v2389_v51 = vld [vmem:[#allocation10 + $0x48] sm:$0xff]  ;;  %s1674_s25 = sshll.u32 %s2829_s24, 4  ;;  %s1676_s2 = sshll.u32 %s3293_s8, 4  ;;  %s1675_s25 = int_to_ptr.vmem [resolvable:$true] %s1674_s25  ;;  %s1677_s2 = int_to_ptr.hbm [resolvable:$true] %s1676_s2 }
  0x2b   :  { %vm166_vm10 = vmand %vm160_vm5, %vm164_vm8  ;;  %vm184_vm15 = vcmp.eq.s32.totalorder %v2920_v6, %v183_v26  ;;  %v193_v28 = vstv %s2933_s28  ;;  %vm200_vm8 = vcmp.eq.s32.totalorder %v2916_v5, 6  ;;  %789 = vmatpush.bf16.msra.mxu2 %v1896_v33  ;;  %v1880_v46 = vor.u32 %v2418_v45, %v1879_v44  ;;  %v2450_v48 = vld [vmem:[#allocation11 + $0x1ac] sm:$0xf0]  ;;  %v1863_v55 = vld [vmem:[#allocation11 + $0x80] sm:$0xf] }
  0x2c   :  { %vm2967_vm11 = vmor %vm158_vm7, %vm166_vm10  ;;  %vm2994_vm4 = vcmp.eq.s32.totalorder %v2920_v6, %v193_v28  ;;  %v203_v32 = vstv %s2945_s29  ;;  %802 = vmatpush.bf16.msra.mxu3 %v2024_v37  ;;  %v2008_v49 = vor.u32 %v2450_v48, %v2007_v47  ;;  %v2414_v56 = vld [vmem:[#allocation11 + $0x8c] sm:$0xf0]  ;;  %v1991_v58 = vld [vmem:[#allocation11 + $0x180] sm:$0xf] }
  0x2d   :  { %vm2978_vm14 = vmand %vm170_vm9, %vm174_vm12  ;;  %357 = vmatpush.bf16.msra.mxu0 %v2384_v11  ;;  %v213_v36 = vstv %s2954_s4  ;;  %vm3010_vm10 = vcmp.eq.s32.totalorder %v2920_v6, %v203_v32  ;;  %v1864_v57 = vor.u32 %v2414_v56, %v1863_v55  ;;  %v2446_v59 = vld [vmem:[#allocation11 + $0x18c] sm:$0xf0]  ;;  %v2424_v62 = vld [vmem:[#allocation11 + $0xe4] sm:$0xf] }
  0x2e   :  { %370 = vmatpush.bf16.msra.mxu1 %v2392_v12  ;;  %vm178_vm2 = vmor %vm2967_vm11, %vm2978_vm14  ;;  %vm210_vm14 = vcmp.eq.s32.totalorder %v2916_v5, 7  ;;  %v1913_v63 = vld [vmem:[#allocation11 + $0xf0] sm:$0xf0]  ;;  %v1992_v0 = vor.u32 %v2446_v59, %v1991_v58  ;;  %v2380_v1 = vld [vmem:[#allocation10] sm:$0xff] }
  0x2f   :  { %vm186_vm6 = vmand %vm180_vm13, %vm184_vm15  ;;  %vm214_vm15 = vcmp.eq.s32.totalorder %v2920_v6, %v213_v36  ;;  %790 = vmatpush.bf16.msra.mxu2 %v1880_v46  ;;  %v2388_v2 = vld [vmem:[#allocation10 + $0x40] sm:$0xff]  ;;  %v2041_v6 = vld [vmem:[#allocation11 + $0x1f0] sm:$0xf0]  ;;  %v1916_v17 = vor.u32 %v2424_v62, %v1913_v63 }
  0x30   :  { %vm3002_vm7 = vmor %vm178_vm2, %vm186_vm6  ;;  %vm147_vm6 = vcmp.eq.s32.totalorder %v3015_v42, %v145_v9  ;;  %803 = vmatpush.bf16.msra.mxu3 %v2008_v49  ;;  %v2456_v4 = vld [vmem:[#allocation11 + $0x1e4] sm:$0xf]  ;;  %v1847_v8 = vld [vmem:[#allocation11 + $0x60] sm:$0xf] }
  0x31   :  { %vm3021_vm11 = vmand %vm190_vm3, %vm2994_vm4  ;;  %358 = vmatpush.bf16.msra.mxu0 %v2383_v23  ;;  %v2410_v9 = vld [vmem:[#allocation11 + $0x6c] sm:$0xf0]  ;;  %v1975_v13 = vld [vmem:[#allocation11 + $0x160] sm:$0xf]  ;;  %v2044_v18 = vor.u32 %v2456_v4, %v2041_v6 }
  0x32   :  { %371 = vmatpush.bf16.msra.mxu1 %v2391_v24  ;;  %vm198_vm12 = vmor %vm3002_vm7, %vm3021_vm11  ;;  %v1848_v12 = vor.u32 %v2410_v9, %v1847_v8  ;;  %v2442_v14 = vld [vmem:[#allocation11 + $0x16c] sm:$0xf0]  ;;  %v2420_v19 = vld [vmem:[#allocation11 + $0xc4] sm:$0xf] }
  0x33   :  { %vm206_vm2 = vmand %vm200_vm8, %vm3010_vm10  ;;  %vm3053_vm10 = vcmp.eq.s32.totalorder %v3015_v42, %v153_v10  ;;  %791 = vmatpush.bf16.msra.mxu2 %v1864_v57  ;;  %v2826_v10 = vmov 0.0   ;;  %v1897_v20 = vld [vmem:[#allocation11 + $0xd0] sm:$0xf0]  ;;  %v2452_v23 = vld [vmem:[#allocation11 + $0x1c4] sm:$0xf] }
  0x34   :  { %vm3037_vm4 = vmor %vm198_vm12, %vm206_vm2  ;;  %804 = vmatpush.bf16.msra.mxu3 %v1992_v0  ;;  %v2025_v24 = vld [vmem:[#allocation11 + $0x1d0] sm:$0xf0]  ;;  %v1831_v27 = vld [vmem:[#allocation11 + $0x40] sm:$0xf]  ;;  %v1900_v35 = vor.u32 %v2420_v19, %v1897_v20 }
  0x35   :  { %vm3046_vm7 = vmand %vm210_vm14, %vm214_vm15  ;;  %359 = vmatpush.bf16.msra.mxu0 %v2382_v38  ;;  %vm3070_vm15 = vcmp.eq.s32.totalorder %v3015_v42, %v163_v15  ;;  %v2406_v29 = vld [vmem:[#allocation11 + $0x4c] sm:$0xf0]  ;;  %v1959_v31 = vld [vmem:[#allocation11 + $0x140] sm:$0xf]  ;;  %v2028_v37 = vor.u32 %v2452_v23, %v2025_v24 }
  0x36   :  { %372 = vmatpush.bf16.msra.mxu1 %v2390_v39  ;;  %vm218_vm11 = vmor %vm3037_vm4, %vm3046_vm7  ;;  %vm3129_vm7 = vcmp.eq.s32.totalorder %v3015_v42, %v193_v28  ;;  %v1832_v28 = vor.u32 %v2406_v29, %v1831_v27  ;;  %v2438_v33 = vld [vmem:[#allocation11 + $0x14c] sm:$0xf0]  ;;  %v2416_v38 = vld [vmem:[#allocation11 + $0xa4] sm:$0xf] }
  0x37   :  { %vm3063_vm12 = vmand %vm142_vm0, %vm147_vm6  ;;  %vm3089_vm6 = vcmp.eq.s32.totalorder %v3015_v42, %v173_v21  ;;  %v1731_v11 = vsel %vm218_vm11, 1.0, %v2826_v10  ;;  %v1976_v21 = vor.u32 %v2442_v14, %v1975_v13  ;;  %792 = vmatpush.bf16.msra.mxu2 %v1848_v12  ;;  %vm3140_vm11 = vcmp.eq.s32.totalorder %v3015_v42, %v203_v32  ;;  %v1881_v39 = vld [vmem:[#allocation11 + $0xb0] sm:$0xf0]  ;;  %v2448_v41 = vld [vmem:[#allocation11 + $0x1a4] sm:$0xf] }
  0x38   :  { %vm3078_vm2 = vmand %vm150_vm1, %vm3053_vm10  ;;  %v224_v25 = vpack.c.bf16 %v1731_v11, %v1731_v11  ;;  %v1960_v40 = vor.u32 %v2438_v33, %v1959_v31  ;;  %v2009_v43 = vld [vmem:[#allocation11 + $0x1b0] sm:$0xf0]  ;;  %v1815_v45 = vld [vmem:[#allocation11 + $0x20] sm:$0xf] }
  0x39   :  { %vm159_vm0 = vmor %vm3063_vm12, %vm3078_vm2  ;;  %360 = vmatpush.bf16.msra.mxu0 %v2381_v50  ;;  %vm3110_vm12 = vcmp.eq.s32.totalorder %v3015_v42, %v183_v26  ;;  %805 = vmatpush.bf16.msra.mxu3 %v1976_v21  ;;  %v2402_v46 = vld [vmem:[#allocation11 + $0x2c] sm:$0xf0]  ;;  %v1943_v48 = vld [vmem:[#allocation11 + $0x120] sm:$0xf] }
  0x3a   :  { %373 = vmatpush.bf16.msra.mxu1 %v2389_v51  ;;  %vm167_vm1 = vmand %vm160_vm5, %vm3070_vm15  ;;  %v1816_v47 = vor.u32 %v2402_v46, %v1815_v45  ;;  %v2434_v49 = vld [vmem:[#allocation11 + $0x12c] sm:$0xf0]  ;;  %v2412_v51 = vld [vmem:[#allocation11 + $0x84] sm:$0xf] }
  0x3b   :  { %vm3103_vm10 = vmor %vm159_vm0, %vm167_vm1  ;;  %793 = vmatpush.bf16.msra.mxu2 %v1832_v28  ;;  %vm3163_vm0 = vcmp.eq.s32.totalorder %v3015_v42, %v213_v36  ;;  %v1884_v36 = vor.u32 %v2416_v38, %v1881_v39  ;;  %v2012_v42 = vor.u32 %v2448_v41, %v2009_v43  ;;  %v1865_v52 = vld [vmem:[#allocation11 + $0x90] sm:$0xf0]  ;;  %v1944_v53 = vor.u32 %v2434_v49, %v1943_v48  ;;  %v2444_v54 = vld [vmem:[#allocation11 + $0x184] sm:$0xf] }
  0x3c   :  { %vm3118_vm5 = vmand %vm170_vm9, %vm3089_vm6  ;;  %v1993_v55 = vld [vmem:[#allocation11 + $0x190] sm:$0xf0]  ;;  %v1799_v56 = vld [vmem:[#allocation11] sm:$0xf]  ;;  %v1868_v59 = vor.u32 %v2412_v51, %v1865_v52 }
  0x3d   :  { %vm179_vm4 = vmor %vm3103_vm10, %vm3118_vm5  ;;  %361 = vmatpush.bf16.msra.mxu0 %v2380_v1  ;;  %806 = vmatpush.bf16.msra.mxu3 %v1960_v40  ;;  %v2398_v57 = vld [vmem:[#allocation11 + $0xc] sm:$0xf0]  ;;  %v1927_v61 = vld [vmem:[#allocation11 + $0x100] sm:$0xf]  ;;  %v1996_v5 = vor.u32 %v2444_v54, %v1993_v55 }
  0x3e   :  { %374 = vmatpush.bf16.msra.mxu1 %v2388_v2  ;;  %vm187_vm9 = vmand %vm180_vm13, %vm3110_vm12  ;;  %v1800_v60 = vor.u32 %v2398_v57, %v1799_v56  ;;  %v2430_v62 = vld [vmem:[#allocation11 + $0x10c] sm:$0xf0]  ;;  %v2408_v0 = vld [vmem:[#allocation11 + $0x64] sm:$0xf] }
  0x3f   :  { %vm3144_vm15 = vmor %vm179_vm4, %vm187_vm9  ;;  %794 = vmatpush.bf16.msra.mxu2 %v1816_v47  ;;  %v1849_v1 = vld [vmem:[#allocation11 + $0x70] sm:$0xf0]  ;;  %v2440_v2 = vld [vmem:[#allocation11 + $0x164] sm:$0xf]  ;;  %v1928_v3 = vor.u32 %v2430_v62, %v1927_v61 }
  0x40   :  { %vm3152_vm13 = vmand %vm190_vm3, %vm3129_vm7  ;;  %362 = vmatmul.bf16.vlgmr.msra.gmra.mxu0 %v224_v25  ;;  %v1977_v4 = vld [vmem:[#allocation11 + $0x170] sm:$0xf0]  ;;  %v1919_v6 = vld [vmem:[#allocation11 + $0xe8] sm:$0xf]  ;;  %v1852_v14 = vor.u32 %v2408_v0, %v1849_v1 }
  0x41   :  { %814 = vmatpush.bf16.msrb.mxu0 %v1916_v17  ;;  %vm199_vm2 = vmor %vm3144_vm15, %vm3152_vm13  ;;  %807 = vmatpush.bf16.msra.mxu3 %v1944_v53  ;;  %v2427_v7 = vld [vmem:[#allocation11 + $0xf4] sm:$0xf0]  ;;  %v2047_v9 = vld [vmem:[#allocation11 + $0x1e8] sm:$0xf]  ;;  %v1980_v15 = vor.u32 %v2440_v2, %v1977_v4 }
  0x42   :  { %827 = vmatpush.bf16.msrb.mxu1 %v2044_v18  ;;  %vm207_vm3 = vmand %vm200_vm8, %vm3140_vm11  ;;  %v1920_v8 = vor.u32 %v2427_v7, %v1919_v6  ;;  %v2404_v11 = vld [vmem:[#allocation11 + $0x44] sm:$0xf]  ;;  %v1833_v12 = vld [vmem:[#allocation11 + $0x50] sm:$0xf0] }
  0x43   :  { %vm3171_vm6 = vmor %vm199_vm2, %vm207_vm3  ;;  %795 = vmatpush.bf16.msra.mxu2 %v1800_v60  ;;  %v1903_v16 = vld [vmem:[#allocation11 + $0xc8] sm:$0xf]  ;;  %v2423_v17 = vld [vmem:[#allocation11 + $0xd4] sm:$0xf0]  ;;  %v1836_v24 = vor.u32 %v2404_v11, %v1833_v12 }
  0x44   :  { %vm217_vm1 = vmand %vm210_vm14, %vm3163_vm0  ;;  %v2031_v18 = vld [vmem:[#allocation11 + $0x1c8] sm:$0xf]  ;;  %v2436_v19 = vld [vmem:[#allocation11 + $0x144] sm:$0xf]  ;;  %v1904_v21 = vor.u32 %v2423_v17, %v1903_v16 }
  0x45   :  { %815 = vmatpush.bf16.msrb.mxu0 %v1900_v35  ;;  %vm219_vm8 = vmor %vm3171_vm6, %vm217_vm1  ;;  %808 = vmatpush.bf16.msra.mxu3 %v1928_v3  ;;  %v1961_v20 = vld [vmem:[#allocation11 + $0x150] sm:$0xf0]  ;;  %v2455_v22 = vld [vmem:[#allocation11 + $0x1d4] sm:$0xf0] }
  0x46   :  { %828 = vmatpush.bf16.msrb.mxu1 %v2028_v37  ;;  %v1732_v58 = vsel %vm219_vm8, 1.0, %v2826_v10  ;;  %v2459_v10 = vld [vmem:[#allocation11 + $0x1f4] sm:$0xf0]  ;;  %v2032_v23 = vor.u32 %v2455_v22, %v2031_v18  ;;  %v1964_v25 = vor.u32 %v2436_v19, %v1961_v20  ;;  %v2400_v26 = vld [vmem:[#allocation11 + $0x24] sm:$0xf] }
  0x47   :  { %v225_v63 = vpack.c.bf16 %v1732_v58, %v1732_v58  ;;  %v2048_v13 = vor.u32 %v2459_v10, %v2047_v9  ;;  %840 = vmatpush.bf16.msrb.mxu2 %v1920_v8  ;;  %v1817_v27 = vld [vmem:[#allocation11 + $0x30] sm:$0xf0]  ;;  %v2432_v29 = vld [vmem:[#allocation11 + $0x124] sm:$0xf]  ;;  %v2425_v38 = vld [vmem:[#allocation11 + $0xec] sm:$0xf] }
  0x48   :  { %v1945_v30 = vld [vmem:[#allocation11 + $0x130] sm:$0xf0]  ;;  %v1820_v28 = vor.u32 %v2400_v26, %v1817_v27  ;;  %v2396_v33 = vld [vmem:[#allocation11 + $0x4] sm:$0xf]  ;;  %v1921_v39 = vld [vmem:[#allocation11 + $0xf8] sm:$0xf0] }
  0x49   :  { %816 = vmatpush.bf16.msrb.mxu0 %v1884_v36  ;;  %375 = vmatmul.bf16.vlgmr.msra.gmra.mxu1 %v225_v63  ;;  %v1948_v31 = vor.u32 %v2432_v29, %v1945_v30  ;;  %v1801_v34 = vld [vmem:[#allocation11 + $0x10] sm:$0xf0]  ;;  %v2428_v35 = vld [vmem:[#allocation11 + $0x104] sm:$0xf]  ;;  %v2457_v40 = vld [vmem:[#allocation11 + $0x1ec] sm:$0xf]  ;;  %v1924_v44 = vor.u32 %v2425_v38, %v1921_v39 }
  0x4a   :  { %829 = vmatpush.bf16.msrb.mxu1 %v2012_v42  ;;  %853 = vmatpush.bf16.msrb.mxu3 %v2048_v13  ;;  %v1929_v37 = vld [vmem:[#allocation11 + $0x110] sm:$0xf0]  ;;  %v2049_v32 = vld [vmem:[#allocation11 + $0x1f8] sm:$0xf0]  ;;  %v1804_v41 = vor.u32 %v2396_v33, %v1801_v34  ;;  %v2421_v46 = vld [vmem:[#allocation11 + $0xcc] sm:$0xf] }
  0x4b   :  { %841 = vmatpush.bf16.msrb.mxu2 %v1904_v21  ;;  %v1932_v43 = vor.u32 %v2428_v35, %v1929_v37  ;;  %v2052_v45 = vor.u32 %v2457_v40, %v2049_v32  ;;  %v1905_v47 = vld [vmem:[#allocation11 + $0xd8] sm:$0xf0]  ;;  %v2453_v48 = vld [vmem:[#allocation11 + $0x1cc] sm:$0xf]  ;;  %v1887_v42 = vld [vmem:[#allocation11 + $0xa8] sm:$0xf] }
  0x4c   :  { %v2033_v49 = vld [vmem:[#allocation11 + $0x1d8] sm:$0xf0]  ;;  %v1908_v50 = vor.u32 %v2421_v46, %v1905_v47  ;;  %v2419_v51 = vld [vmem:[#allocation11 + $0xb4] sm:$0xf0]  ;;  %v2015_v52 = vld [vmem:[#allocation11 + $0x1a8] sm:$0xf] }
  0x4d   :  { %817 = vmatpush.bf16.msrb.mxu0 %v1868_v59  ;;  %v2036_v36 = vor.u32 %v2453_v48, %v2033_v49  ;;  %v1888_v53 = vor.u32 %v2419_v51, %v1887_v42  ;;  %v2451_v54 = vld [vmem:[#allocation11 + $0x1b4] sm:$0xf0]  ;;  %v2417_v55 = vld [vmem:[#allocation11 + $0xac] sm:$0xf]  ;;  %v1889_v56 = vld [vmem:[#allocation11 + $0xb8] sm:$0xf0] }
  0x4e   :  { %830 = vmatpush.bf16.msrb.mxu1 %v1996_v5  ;;  %854 = vmatpush.bf16.msrb.mxu3 %v2032_v23  ;;  %v2016_v57 = vor.u32 %v2451_v54, %v2015_v52  ;;  %v1892_v58 = vor.u32 %v2417_v55, %v1889_v56  ;;  %v2449_v59 = vld [vmem:[#allocation11 + $0x1ac] sm:$0xf]  ;;  %v2017_v60 = vld [vmem:[#allocation11 + $0x1b8] sm:$0xf0]  ;;  %v1871_v62 = vld [vmem:[#allocation11 + $0x88] sm:$0xf] }
  0x4f   :  { %842 = vmatpush.bf16.msrb.mxu2 %v1888_v53  ;;  %v2020_v61 = vor.u32 %v2449_v59, %v2017_v60  ;;  %v2415_v63 = vld [vmem:[#allocation11 + $0x94] sm:$0xf0]  ;;  %v1999_v5 = vld [vmem:[#allocation11 + $0x188] sm:$0xf]  ;;  %v2413_v2 = vld [vmem:[#allocation11 + $0x8c] sm:$0xf] }
  0x50   :  { %v1872_v0 = vor.u32 %v2415_v63, %v1871_v62  ;;  %v2447_v1 = vld [vmem:[#allocation11 + $0x194] sm:$0xf0]  ;;  %v1873_v3 = vld [vmem:[#allocation11 + $0x98] sm:$0xf0]  ;;  %v2445_v7 = vld [vmem:[#allocation11 + $0x18c] sm:$0xf] }
  0x51   :  { %818 = vmatpush.bf16.msrb.mxu0 %v1852_v14  ;;  %v2000_v4 = vor.u32 %v2447_v1, %v1999_v5  ;;  %v1876_v6 = vor.u32 %v2413_v2, %v1873_v3  ;;  %v2001_v8 = vld [vmem:[#allocation11 + $0x198] sm:$0xf0]  ;;  %v1855_v10 = vld [vmem:[#allocation11 + $0x68] sm:$0xf]  ;;  %v2411_v11 = vld [vmem:[#allocation11 + $0x74] sm:$0xf0] }
  0x52   :  { %831 = vmatpush.bf16.msrb.mxu1 %v1980_v15  ;;  %855 = vmatpush.bf16.msrb.mxu3 %v2016_v57  ;;  %v2004_v9 = vor.u32 %v2445_v7, %v2001_v8  ;;  %v1983_v12 = vld [vmem:[#allocation11 + $0x168] sm:$0xf]  ;;  %v1856_v13 = vor.u32 %v2411_v11, %v1855_v10  ;;  %v2443_v14 = vld [vmem:[#allocation11 + $0x174] sm:$0xf0]  ;;  %v2409_v15 = vld [vmem:[#allocation11 + $0x6c] sm:$0xf] }
  0x53   :  { %843 = vmatpush.bf16.msrb.mxu2 %v1872_v0  ;;  %v1857_v16 = vld [vmem:[#allocation11 + $0x78] sm:$0xf0]  ;;  %v1984_v17 = vor.u32 %v2443_v14, %v1983_v12  ;;  %v2441_v19 = vld [vmem:[#allocation11 + $0x16c] sm:$0xf]  ;;  %v1839_v21 = vld [vmem:[#allocation11 + $0x48] sm:$0xf] }
  0x54   :  { %v1860_v18 = vor.u32 %v2409_v15, %v1857_v16  ;;  %v1985_v20 = vld [vmem:[#allocation11 + $0x178] sm:$0xf0]  ;;  %v2407_v23 = vld [vmem:[#allocation11 + $0x54] sm:$0xf0]  ;;  %v2405_v29 = vld [vmem:[#allocation11 + $0x4c] sm:$0xf] }
  0x55   :  { %819 = vmatpush.bf16.msrb.mxu0 %v1836_v24  ;;  %v1988_v22 = vor.u32 %v2441_v19, %v1985_v20  ;;  %v1967_v24 = vld [vmem:[#allocation11 + $0x148] sm:$0xf]  ;;  %v1840_v26 = vor.u32 %v2407_v23, %v1839_v21  ;;  %v1841_v30 = vld [vmem:[#allocation11 + $0x58] sm:$0xf0]  ;;  %v2403_v35 = vld [vmem:[#allocation11 + $0x34] sm:$0xf0] }
  0x56   :  { %832 = vmatpush.bf16.msrb.mxu1 %v1964_v25  ;;  %856 = vmatpush.bf16.msrb.mxu3 %v2000_v4  ;;  %v2439_v25 = vld [vmem:[#allocation11 + $0x154] sm:$0xf0]  ;;  %v1969_v33 = vld [vmem:[#allocation11 + $0x158] sm:$0xf0]  ;;  %v1823_v34 = vld [vmem:[#allocation11 + $0x28] sm:$0xf] }
  0x57   :  { %844 = vmatpush.bf16.msrb.mxu2 %v1856_v13  ;;  %v1968_v27 = vor.u32 %v2439_v25, %v1967_v24  ;;  %v1951_v38 = vld [vmem:[#allocation11 + $0x128] sm:$0xf]  ;;  %v2435_v39 = vld [vmem:[#allocation11 + $0x134] sm:$0xf0]  ;;  %v2401_v40 = vld [vmem:[#allocation11 + $0x2c] sm:$0xf]  ;;  %v1824_v32 = vor.u32 %v2403_v35, %v1823_v34 }
  0x58   :  { %v1807_v47 = vld [vmem:[#allocation11 + $0x8] sm:$0xf]  ;;  %v2399_v48 = vld [vmem:[#allocation11 + $0x14] sm:$0xf0]  ;;  %v2397_v42 = vld [vmem:[#allocation11 + $0xc] sm:$0xf] }
  0x59   :  { %820 = vmatpush.bf16.msrb.mxu0 %v1820_v28  ;;  %v2437_v28 = vld [vmem:[#allocation11 + $0x14c] sm:$0xf]  ;;  %v1935_v49 = vld [vmem:[#allocation11 + $0x108] sm:$0xf]  ;;  %v1809_v51 = vld [vmem:[#allocation11 + $0x18] sm:$0xf0]  ;;  %v1808_v54 = vor.u32 %v2399_v48, %v1807_v47 }
  0x5a   :  { %833 = vmatpush.bf16.msrb.mxu1 %v1948_v31  ;;  %857 = vmatpush.bf16.msrb.mxu3 %v1984_v17  ;;  %v1844_v31 = vor.u32 %v2405_v29, %v1841_v30  ;;  %v1972_v37 = vor.u32 %v2437_v28, %v1969_v33  ;;  %v2429_v52 = vld [vmem:[#allocation11 + $0x10c] sm:$0xf]  ;;  %v1937_v53 = vld [vmem:[#allocation11 + $0x118] sm:$0xf0]  ;;  %v1812_v56 = vor.u32 %v2397_v42, %v1809_v51  ;;  %v129_v59 = vld [vmem:[#allocation7] sm:$0xff] }
  0x5b   :  { %845 = vmatpush.bf16.msrb.mxu2 %v1840_v26  ;;  %v1940_v57 = vor.u32 %v2429_v52, %v1937_v53  ;;  %v2171_v4 = vld [vmem:[#allocation11 + $0x2e0] sm:$0xf]  ;;  %v2488_v10 = vld [vmem:[#allocation11 + $0x2e4] sm:$0xf]  ;;  %v2173_v11 = vld [vmem:[#allocation11 + $0x2f0] sm:$0xf0] }
  0x5c   :  { %v2299_v7 = vld [vmem:[#allocation11 + $0x3e0] sm:$0xf]  ;;  %v2176_v13 = vor.u32 %v2488_v10, %v2173_v11  ;;  %v2520_v14 = vld [vmem:[#allocation11 + $0x3e4] sm:$0xf]  ;;  %v2301_v15 = vld [vmem:[#allocation11 + $0x3f0] sm:$0xf0] }
  0x5d   :  { %821 = vmatpush.bf16.msrb.mxu0 %v1804_v41  ;;  %v1825_v41 = vld [vmem:[#allocation11 + $0x38] sm:$0xf0]  ;;  %v2304_v16 = vor.u32 %v2520_v14, %v2301_v15  ;;  %v2155_v17 = vld [vmem:[#allocation11 + $0x2c0] sm:$0xf]  ;;  %v2518_v21 = vld [vmem:[#allocation11 + $0x3cc] sm:$0xf0] }
  0x5e   :  { %834 = vmatpush.bf16.msrb.mxu1 %v1932_v43  ;;  %v2433_v43 = vld [vmem:[#allocation11 + $0x12c] sm:$0xf]  ;;  %858 = vmatpush.bf16.msrb.mxu3 %v1968_v27  ;;  %v1828_v46 = vor.u32 %v2401_v40, %v1825_v41  ;;  %v2283_v20 = vld [vmem:[#allocation11 + $0x3c0] sm:$0xf]  ;;  %v2157_v24 = vld [vmem:[#allocation11 + $0x2d0] sm:$0xf0] }
  0x5f   :  { %846 = vmatpush.bf16.msrb.mxu2 %v1824_v32  ;;  %v2284_v23 = vor.u32 %v2518_v21, %v2283_v20  ;;  %v2516_v25 = vld [vmem:[#allocation11 + $0x3c4] sm:$0xf]  ;;  %v2285_v26 = vld [vmem:[#allocation11 + $0x3d0] sm:$0xf0]  ;;  %v2139_v30 = vld [vmem:[#allocation11 + $0x2a0] sm:$0xf] }
  0x60   :  { %v2288_v29 = vor.u32 %v2516_v25, %v2285_v26  ;;  %v2482_v28 = vld [vmem:[#allocation11 + $0x2ac] sm:$0xf0]  ;;  %v2480_v35 = vld [vmem:[#allocation11 + $0x2a4] sm:$0xf]  ;;  %v2269_v40 = vld [vmem:[#allocation11 + $0x3b0] sm:$0xf0] }
  0x61   :  { %866 = vmatpush.bf16.msra.mxu0 %v1924_v44  ;;  %v1953_v44 = vld [vmem:[#allocation11 + $0x138] sm:$0xf0]  ;;  %v2140_v33 = vor.u32 %v2482_v28, %v2139_v30  ;;  %v2514_v34 = vld [vmem:[#allocation11 + $0x3ac] sm:$0xf0]  ;;  %v3185_v32 = vld [vmem:[%s3290_s5] sm:$0xf] }
  0x62   :  { %879 = vmatpush.bf16.msra.mxu1 %v2052_v45  ;;  %v1952_v45 = vor.u32 %v2435_v39, %v1951_v38  ;;  %v2141_v38 = vld [vmem:[#allocation11 + $0x2b0] sm:$0xf0]  ;;  %v2512_v39 = vld [vmem:[#allocation11 + $0x3a4] sm:$0xf]  ;;  %v2510_v48 = vld [vmem:[#allocation11 + $0x38c] sm:$0xf0] }
  0x63   :  { %847 = vmatpush.bf16.msrb.mxu2 %v1808_v54  ;;  %v2144_v41 = vor.u32 %v2480_v35, %v2141_v38  ;;  %v2508_v51 = vld [vmem:[#allocation11 + $0x384] sm:$0xf]  ;;  %v2253_v52 = vld [vmem:[#allocation11 + $0x390] sm:$0xf0]  ;;  %v454_v53 = vperm.slane %v3185_v32, 1  ;;  %v456_v35 = vperm.slane %v3185_v32, 3 }
  0x64   :  { %859 = vmatpush.bf16.msrb.mxu3 %v1952_v45  ;;  %v2478_v45 = vld [vmem:[#allocation11 + $0x28c] sm:$0xf0]  ;;  %v2256_v54 = vor.u32 %v2508_v51, %v2253_v52  ;;  %v2219_v10 = vld [vmem:[#allocation11 + $0x340] sm:$0xf]  ;;  %v2093_v14 = vld [vmem:[#allocation11 + $0x250] sm:$0xf0] }
  0x65   :  { %867 = vmatpush.bf16.msra.mxu0 %v1908_v50  ;;  %v1956_v50 = vor.u32 %v2433_v43, %v1953_v44  ;;  %v2272_v43 = vor.u32 %v2512_v39, %v2269_v40  ;;  %v2123_v44 = vld [vmem:[#allocation11 + $0x280] sm:$0xf]  ;;  %v2502_v11 = vld [vmem:[#allocation11 + $0x34c] sm:$0xf0]  ;;  %v2500_v15 = vld [vmem:[#allocation11 + $0x344] sm:$0xf] }
  0x66   :  { %880 = vmatpush.bf16.msra.mxu1 %v2036_v36  ;;  %v2431_v36 = vld [vmem:[#allocation11 + $0x114] sm:$0xf0]  ;;  %v2124_v47 = vor.u32 %v2478_v45, %v2123_v44  ;;  %v2075_v20 = vld [vmem:[#allocation11 + $0x220] sm:$0xf]  ;;  %v2466_v21 = vld [vmem:[#allocation11 + $0x22c] sm:$0xf0] }
  0x67   :  { %v1936_v55 = vor.u32 %v2431_v36, %v1935_v49  ;;  %v2476_v49 = vld [vmem:[#allocation11 + $0x284] sm:$0xf]  ;;  %v2076_v26 = vor.u32 %v2466_v21, %v2075_v20  ;;  %v2462_v44 = vld [vmem:[#allocation11 + $0x20c] sm:$0xf0]  ;;  %v2187_v45 = vld [vmem:[#allocation11 + $0x300] sm:$0xf] }
  0x68   :  { %v2492_v51 = vld [vmem:[#allocation11 + $0x304] sm:$0xf]  ;;  %v2189_v52 = vld [vmem:[#allocation11 + $0x310] sm:$0xf0]  ;;  %v2147_v20 = vld [vmem:[#allocation11 + $0x2a8] sm:$0xf] }
  0x69   :  { %868 = vmatpush.bf16.msra.mxu0 %v1892_v58  ;;  %860 = vmatpush.bf16.msrb.mxu3 %v1936_v55  ;;  %v2107_v55 = vld [vmem:[#allocation11 + $0x260] sm:$0xf]  ;;  %v2483_v21 = vld [vmem:[#allocation11 + $0x2b4] sm:$0xf0] }
  0x6a   :  { %881 = vmatpush.bf16.msra.mxu1 %v2020_v61 }
  0x6d   :  { %869 = vmatpush.bf16.msra.mxu0 %v1876_v6  ;;  %v2490_v6 = vld [vmem:[#allocation11 + $0x2ec] sm:$0xf0] }
  0x6e   :  { %882 = vmatpush.bf16.msra.mxu1 %v2004_v9  ;;  %v2172_v8 = vor.u32 %v2490_v6, %v2171_v4  ;;  %v2522_v9 = vld [vmem:[#allocation11 + $0x3ec] sm:$0xf0]  ;;  %v453_v4 = vperm.slane %v3185_v32, 0  ;;  %v2091_v6 = vld [vmem:[#allocation11 + $0x240] sm:$0xf] }
  0x6f   :  { %v2300_v12 = vor.u32 %v2522_v9, %v2299_v7  ;;  %v2470_v7 = vld [vmem:[#allocation11 + $0x24c] sm:$0xf0] }
  0x70   :  { %v2092_v9 = vor.u32 %v2470_v7, %v2091_v6  ;;  %v2487_v7 = vld [vmem:[#allocation11 + $0x2d4] sm:$0xf0] }
  0x71   :  { %870 = vmatpush.bf16.msra.mxu0 %v1860_v18  ;;  %v2486_v18 = vld [vmem:[#allocation11 + $0x2cc] sm:$0xf0] }
  0x72   :  { %883 = vmatpush.bf16.msra.mxu1 %v1988_v22  ;;  %v2156_v19 = vor.u32 %v2486_v18, %v2155_v17  ;;  %v2484_v22 = vld [vmem:[#allocation11 + $0x2c4] sm:$0xf] }
  0x73   :  { %v2160_v27 = vor.u32 %v2484_v22, %v2157_v24  ;;  %v2203_v22 = vld [vmem:[#allocation11 + $0x320] sm:$0xf] }
  0x75   :  { %871 = vmatpush.bf16.msra.mxu0 %v1844_v31  ;;  %v2267_v31 = vld [vmem:[#allocation11 + $0x3a0] sm:$0xf] }
  0x76   :  { %884 = vmatpush.bf16.msra.mxu1 %v1972_v37  ;;  %v2268_v37 = vor.u32 %v2514_v34, %v2267_v31  ;;  %v2077_v31 = vld [vmem:[#allocation11 + $0x230] sm:$0xf0] }
  0x77   :  { %v2205_v34 = vld [vmem:[#allocation11 + $0x330] sm:$0xf0] }
  0x79   :  { %872 = vmatpush.bf16.msra.mxu0 %v1828_v46  ;;  %v2251_v46 = vld [vmem:[#allocation11 + $0x380] sm:$0xf] }
  0x7a   :  { %885 = vmatpush.bf16.msra.mxu1 %v1956_v50  ;;  %v2125_v50 = vld [vmem:[#allocation11 + $0x290] sm:$0xf0]  ;;  %v2252_v36 = vor.u32 %v2510_v48, %v2251_v46  ;;  %v2460_v48 = vld [vmem:[#allocation11 + $0x204] sm:$0xf] }
  0x7b   :  { %v2128_v42 = vor.u32 %v2476_v49, %v2125_v50  ;;  %v2061_v49 = vld [vmem:[#allocation11 + $0x210] sm:$0xf0] }
  0x7d   :  { %873 = vmatpush.bf16.msra.mxu0 %v1812_v56  ;;  %v2474_v56 = vld [vmem:[#allocation11 + $0x26c] sm:$0xf0] }
  0x7e   :  { %886 = vmatpush.bf16.msra.mxu1 %v1940_v57  ;;  %v2235_v57 = vld [vmem:[#allocation11 + $0x360] sm:$0xf] }
  0xbd   :  { %v363_v58 = vpop.f32.mrf.mxu0 }
  0xc5   :  { %v365_v61 = vpop.f32.mrf.mxu0 }
  0xc6   :  { %v376_v60 = vpop.f32.mrf.mxu1  ;;  %v2109_v61 = vld [vmem:[#allocation11 + $0x270] sm:$0xf0] }
  0xc7   :  { %v377_v62 = vadd.f32 %v376_v60, %v363_v58  ;;  %v2108_v58 = vor.u32 %v2474_v56, %v2107_v55  ;;  %v2472_v60 = vld [vmem:[#allocation11 + $0x264] sm:$0xf]  ;;  %v2491_v55 = vld [vmem:[#allocation11 + $0x2f4] sm:$0xf0]  ;;  %v2307_v56 = vld [vmem:[#allocation11 + $0x3e8] sm:$0xf] }
  0xc9   :  { %v2543_v63 = vpack.c.bf16 %v129_v59, %v377_v62  ;;  %v2506_v59 = vld [vmem:[#allocation11 + $0x36c] sm:$0xf0] }
  0xca   :  { %v2236_v62 = vor.u32 %v2506_v59, %v2235_v57  ;;  %v2489_v59 = vld [vmem:[#allocation11 + $0x2ec] sm:$0xf] }
  0xcb   :  { %v462_v5 = vunpack.c.l.b16 %v2543_v63  ;;  %v463_v0 = vunpack.c.h.b16 %v2543_v63  ;;  %v2112_v63 = vor.u32 %v2472_v60, %v2109_v61  ;;  %v2181_v60 = vld [vmem:[#allocation11 + $0x2f8] sm:$0xf0] }
  0xcd   :  { %v464_v1 = vpack.c.b16 %v462_v5, %v462_v5  ;;  %v465_v2 = vpack.c.b16 %v463_v0, %v463_v0  ;;  %v2504_v5 = vld [vmem:[#allocation11 + $0x364] sm:$0xf]  ;;  %v2237_v0 = vld [vmem:[#allocation11 + $0x370] sm:$0xf0] }
  0xce   :  { %v378_v3 = vpop.f32.mrf.mxu1 }
  0xcf   :  { %796 = vmatmul.bf16.vlgmr.msra.gmra.mxu2 %v464_v1  ;;  %809 = vmatmul.bf16.vlgmr.msra.gmra.mxu3 %v465_v2 }
  0xd0   :  { %822 = vmatmul.bf16.vlgmr.msrb.gmra.mxu0 %v464_v1  ;;  %835 = vmatmul.bf16.vlgmr.msrb.gmra.mxu1 %v465_v2 }
  0xd1   :  { %1369 = vmatpush.bf16.msra.mxu2 %v2172_v8  ;;  %1382 = vmatpush.bf16.msra.mxu3 %v2300_v12  ;;  %v2468_v12 = vld [vmem:[#allocation11 + $0x244] sm:$0xf] }
  0xd2   :  { %1395 = vmatpush.bf16.msrb.mxu0 %v2176_v13  ;;  %1408 = vmatpush.bf16.msrb.mxu1 %v2304_v16  ;;  %v2220_v13 = vor.u32 %v2502_v11, %v2219_v10  ;;  %v2221_v16 = vld [vmem:[#allocation11 + $0x350] sm:$0xf0]  ;;  %v2096_v18 = vor.u32 %v2468_v12, %v2093_v14  ;;  %v2519_v10 = vld [vmem:[#allocation11 + $0x3d4] sm:$0xf0]  ;;  %v2485_v11 = vld [vmem:[#allocation11 + $0x2cc] sm:$0xf] }
  0xd3   :  { %v2165_v12 = vld [vmem:[#allocation11 + $0x2d8] sm:$0xf0] }
  0xd5   :  { %1370 = vmatpush.bf16.msra.mxu2 %v2156_v19  ;;  %1383 = vmatpush.bf16.msra.mxu3 %v2284_v23  ;;  %v2224_v19 = vor.u32 %v2500_v15, %v2221_v16  ;;  %v2517_v15 = vld [vmem:[#allocation11 + $0x3cc] sm:$0xf] }
  0xd6   :  { %1396 = vmatpush.bf16.msrb.mxu0 %v2160_v27  ;;  %1409 = vmatpush.bf16.msrb.mxu1 %v2288_v29  ;;  %v2498_v27 = vld [vmem:[#allocation11 + $0x32c] sm:$0xf0]  ;;  %v2464_v29 = vld [vmem:[#allocation11 + $0x224] sm:$0xf] }
  0xd7   :  { %v2204_v28 = vor.u32 %v2498_v27, %v2203_v22 }
  0xd9   :  { %1371 = vmatpush.bf16.msra.mxu2 %v2140_v33  ;;  %1384 = vmatpush.bf16.msra.mxu3 %v2268_v37  ;;  %v2496_v33 = vld [vmem:[#allocation11 + $0x324] sm:$0xf]  ;;  %v2080_v37 = vor.u32 %v2464_v29, %v2077_v31  ;;  %v2481_v31 = vld [vmem:[#allocation11 + $0x2ac] sm:$0xf] }
  0xda   :  { %1397 = vmatpush.bf16.msrb.mxu0 %v2144_v41  ;;  %1410 = vmatpush.bf16.msrb.mxu1 %v2272_v43  ;;  %v2208_v38 = vor.u32 %v2496_v33, %v2205_v34  ;;  %v2059_v43 = vld [vmem:[#allocation11 + $0x200] sm:$0xf]  ;;  %v2149_v33 = vld [vmem:[#allocation11 + $0x2b8] sm:$0xf0] }
  0xdb   :  { %v2060_v46 = vor.u32 %v2462_v44, %v2059_v43  ;;  %v2152_v34 = vor.u32 %v2481_v31, %v2149_v33  ;;  %v2479_v43 = vld [vmem:[#allocation11 + $0x294] sm:$0xf0] }
  0xdd   :  { %1372 = vmatpush.bf16.msra.mxu2 %v2124_v47  ;;  %1385 = vmatpush.bf16.msra.mxu3 %v2252_v36  ;;  %v2494_v47 = vld [vmem:[#allocation11 + $0x30c] sm:$0xf0] }
  0xde   :  { %1398 = vmatpush.bf16.msrb.mxu0 %v2128_v42  ;;  %1411 = vmatpush.bf16.msrb.mxu1 %v2256_v54  ;;  %v2188_v36 = vor.u32 %v2494_v47, %v2187_v45  ;;  %v2064_v42 = vor.u32 %v2460_v48, %v2061_v49  ;;  %v2179_v54 = vld [vmem:[#allocation11 + $0x2e8] sm:$0xf]  ;;  %v2511_v47 = vld [vmem:[#allocation11 + $0x394] sm:$0xf0] }
  0xdf   :  { %848 = vmatmul.bf16.vlgmr.msrb.gmra.mxu2 %v464_v1  ;;  %861 = vmatmul.bf16.vlgmr.msrb.gmra.mxu3 %v465_v2  ;;  %v2180_v57 = vor.u32 %v2491_v55, %v2179_v54 }
  0xe0   :  { %874 = vmatmul.bf16.vlgmr.msra.gmra.mxu0 %v464_v1  ;;  %887 = vmatmul.bf16.vlgmr.msra.gmra.mxu1 %v465_v2  ;;  %v2240_v1 = vor.u32 %v2504_v5, %v2237_v0  ;;  %v2184_v0 = vor.u32 %v2489_v59, %v2181_v60  ;;  %v2115_v60 = vld [vmem:[#allocation11 + $0x268] sm:$0xf] }
  0xe1   :  { %1373 = vmatpush.bf16.msra.mxu2 %v2108_v58  ;;  %1386 = vmatpush.bf16.msra.mxu3 %v2236_v62  ;;  %v2523_v58 = vld [vmem:[#allocation11 + $0x3f4] sm:$0xf0] }
  0xe2   :  { %1399 = vmatpush.bf16.msrb.mxu0 %v2112_v63  ;;  %1412 = vmatpush.bf16.msrb.mxu1 %v2240_v1  ;;  %v2308_v5 = vor.u32 %v2523_v58, %v2307_v56  ;;  %v2521_v1 = vld [vmem:[#allocation11 + $0x3ec] sm:$0xf] }
  0xe3   :  { %v2509_v56 = vld [vmem:[#allocation11 + $0x38c] sm:$0xf] }
  0xe5   :  { %1374 = vmatpush.bf16.msra.mxu2 %v2092_v9  ;;  %1387 = vmatpush.bf16.msra.mxu3 %v2220_v13 }
  0xe6   :  { %1400 = vmatpush.bf16.msrb.mxu0 %v2096_v18  ;;  %1413 = vmatpush.bf16.msrb.mxu1 %v2224_v19  ;;  %v2168_v18 = vor.u32 %v2485_v11, %v2165_v12  ;;  %v2293_v19 = vld [vmem:[#allocation11 + $0x3d8] sm:$0xf0] }
  0xe9   :  { %1375 = vmatpush.bf16.msra.mxu2 %v2076_v26  ;;  %1388 = vmatpush.bf16.msra.mxu3 %v2204_v28  ;;  %v2515_v26 = vld [vmem:[#allocation11 + $0x3b4] sm:$0xf0] }
  0xea   :  { %1401 = vmatpush.bf16.msrb.mxu0 %v2080_v37  ;;  %1414 = vmatpush.bf16.msrb.mxu1 %v2208_v38  ;;  %v2277_v37 = vld [vmem:[#allocation11 + $0x3b8] sm:$0xf0]  ;;  %v2131_v38 = vld [vmem:[#allocation11 + $0x288] sm:$0xf] }
  0xeb   :  { %v2132_v45 = vor.u32 %v2479_v43, %v2131_v38 }
  0xed   :  { %1376 = vmatpush.bf16.msra.mxu2 %v2060_v46  ;;  %1389 = vmatpush.bf16.msra.mxu3 %v2188_v36  ;;  %v2259_v46 = vld [vmem:[#allocation11 + $0x388] sm:$0xf]  ;;  %v2477_v36 = vld [vmem:[#allocation11 + $0x28c] sm:$0xf] }
  0xee   :  { %1402 = vmatpush.bf16.msrb.mxu0 %v2064_v42  ;;  %v2133_v42 = vld [vmem:[#allocation11 + $0x298] sm:$0xf0]  ;;  %v2260_v54 = vor.u32 %v2511_v47, %v2259_v46  ;;  %v133_v47 = vld [vmem:[#allocation8] sm:$0xff] }
  0xef   :  { %v2136_v55 = vor.u32 %v2477_v36, %v2133_v42  ;;  %v2085_v46 = vld [vmem:[#allocation11 + $0x238] sm:$0xf0]  ;;  %v2497_v36 = vld [vmem:[#allocation11 + $0x32c] sm:$0xf] }
  0xf0   :  { %v2213_v42 = vld [vmem:[#allocation11 + $0x338] sm:$0xf0] }
  0xf1   :  { %1421 = vmatpush.bf16.msrb.mxu2 %v2180_v57  ;;  %1434 = vmatpush.bf16.msrb.mxu3 %v2308_v5  ;;  %v2261_v57 = vld [vmem:[#allocation11 + $0x398] sm:$0xf0]  ;;  %v2507_v5 = vld [vmem:[#allocation11 + $0x374] sm:$0xf0] }
  0xf2   :  { %1447 = vmatpush.bf16.msra.mxu0 %v2184_v0  ;;  %v2264_v59 = vor.u32 %v2509_v56, %v2261_v57  ;;  %v2473_v0 = vld [vmem:[#allocation11 + $0x26c] sm:$0xf]  ;;  %v2216_v56 = vor.u32 %v2497_v36, %v2213_v42  ;;  %v2195_v57 = vld [vmem:[#allocation11 + $0x308] sm:$0xf] }
  0xf6   :  { %1448 = vmatpush.bf16.msra.mxu0 %v2168_v18 }
  0xfa   :  { %1449 = vmatpush.bf16.msra.mxu0 %v2152_v34  ;;  %v2229_v34 = vld [vmem:[#allocation11 + $0x358] sm:$0xf0] }
  0xfe   :  { %1450 = vmatpush.bf16.msra.mxu0 %v2136_v55 }
 0x14d   :  { %v823_v2 = vpop.f32.mrf.mxu0  ;;  %v836_v3 = vpop.f32.mrf.mxu1 }
 0x14e   :  { %v824_v8 = vadd.f32 %v823_v2, %v454_v53  ;;  %v2192_v53 = vor.u32 %v2492_v51, %v2189_v52  ;;  %v2309_v2 = vld [vmem:[#allocation11 + $0x3f8] sm:$0xf0] }
 0x14f   :  { %v2312_v6 = vor.u32 %v2521_v1, %v2309_v2 }
 0x150   :  { %v837_v17 = vadd.f32 %v836_v3, %v824_v8  ;;  %1415 = vmatpush.bf16.msrb.mxu1 %v2192_v53  ;;  %v2163_v3 = vld [vmem:[#allocation11 + $0x2c8] sm:$0xf] }
 0x151   :  { %v2291_v8 = vld [vmem:[#allocation11 + $0x3c8] sm:$0xf]  ;;  %v2164_v9 = vor.u32 %v2487_v7, %v2163_v3  ;;  %v2117_v7 = vld [vmem:[#allocation11 + $0x278] sm:$0xf0] }
 0x152   :  { %v2054_v23 = vmul.f32 -1.442695, %v837_v17  ;;  %v797_v24 = vpop.f32.mrf.mxu2  ;;  %v810_v25 = vpop.f32.mrf.mxu3  ;;  %v2292_v17 = vor.u32 %v2519_v10, %v2291_v8  ;;  %v2505_v8 = vld [vmem:[#allocation11 + $0x36c] sm:$0xf]  ;;  %v2120_v11 = vor.u32 %v2473_v0, %v2117_v7 }
 0x153   :  { %v798_v30 = vadd.f32 %v797_v24, %v453_v4  ;;  %1422 = vmatpush.bf16.msrb.mxu2 %v2164_v9  ;;  %v2148_v24 = vor.u32 %v2483_v21, %v2147_v20  ;;  %v2245_v9 = vld [vmem:[#allocation11 + $0x378] sm:$0xf0] }
 0x154   :  { %2566 = vpow2.f32 %v2054_v23  ;;  %1460 = vmatpush.bf16.msra.mxu1 %v2312_v6  ;;  %v2296_v23 = vor.u32 %v2517_v15, %v2293_v19  ;;  %1435 = vmatpush.bf16.msrb.mxu3 %v2292_v17  ;;  %v2248_v12 = vor.u32 %v2505_v8, %v2245_v9  ;;  %v2227_v15 = vld [vmem:[#allocation11 + $0x348] sm:$0xf] }
 0x155   :  { %v811_v39 = vadd.f32 %v810_v25, %v798_v30  ;;  %v825_v40 = vpop.f32.mrf.mxu0  ;;  %v838_v41 = vpop.f32.mrf.mxu1  ;;  %v2275_v25 = vld [vmem:[#allocation11 + $0x3a8] sm:$0xf]  ;;  %v455_v30 = vperm.slane %v3185_v32, 2  ;;  %1451 = vmatpush.bf16.msra.mxu0 %v2120_v11 }
 0x156   :  { %v2276_v28 = vor.u32 %v2515_v26, %v2275_v25 }
 0x157   :  { %v2053_v50 = vmul.f32 -1.442695, %v811_v39  ;;  %1423 = vmatpush.bf16.msrb.mxu2 %v2148_v24 }
 0x158   :  { %1461 = vmatpush.bf16.msra.mxu1 %v2296_v23  ;;  %1436 = vmatpush.bf16.msrb.mxu3 %v2276_v28  ;;  %v2469_v23 = vld [vmem:[#allocation11 + $0x24c] sm:$0xf] }
 0x159   :  { %2568 = vpow2.f32 %v2053_v50  ;;  %v2501_v28 = vld [vmem:[#allocation11 + $0x34c] sm:$0xf] }
 0x15a   :  { %v2567_v61 = vpop.eup %2566  ;;  %v799_v62 = vpop.f32.mrf.mxu2 }
 0x15b   :  { %v812_v63 = vpop.f32.mrf.mxu3  ;;  %v3190_v4 = vadd.f32 1.0, %v2567_v61  ;;  %v2475_v61 = vld [vmem:[#allocation11 + $0x274] sm:$0xf0]  ;;  %1424 = vmatpush.bf16.msrb.mxu2 %v2132_v45  ;;  %v2465_v45 = vld [vmem:[#allocation11 + $0x22c] sm:$0xf] }
 0x15c   :  { %v2116_v62 = vor.u32 %v2475_v61, %v2115_v60  ;;  %v2243_v63 = vld [vmem:[#allocation11 + $0x368] sm:$0xf]  ;;  %1437 = vmatpush.bf16.msrb.mxu3 %v2260_v54  ;;  %v2463_v54 = vld [vmem:[#allocation11 + $0x214] sm:$0xf0] }
 0x15d   :  { %2570 = vrcp.f32 %v3190_v4  ;;  %v875_v13 = vpop.f32.mrf.mxu0  ;;  %v888_v14 = vpop.f32.mrf.mxu1  ;;  %v924_v50 = vand.u32 2147483647, %v3190_v4  ;;  %v2244_v6 = vor.u32 %v2507_v5, %v2243_v63  ;;  %vm920_vm10 = vweird.f32 %v3190_v4  ;;  %v2493_v63 = vld [vmem:[#allocation11 + $0x30c] sm:$0xf]  ;;  %v2197_v5 = vld [vmem:[#allocation11 + $0x318] sm:$0xf0] }
 0x15e   :  { %v876_v16 = vadd.f32 %v875_v13, %v456_v35  ;;  %v2513_v35 = vld [vmem:[#allocation11 + $0x3ac] sm:$0xf]  ;;  %v2099_v13 = vld [vmem:[#allocation11 + $0x248] sm:$0xf]  ;;  %v926_v17 = vand.u32 2147483648, %v3190_v4 }
 0x15f   :  { %v2569_v22 = vpop.eup %2568  ;;  %v2280_v32 = vor.u32 %v2513_v35, %v2277_v37  ;;  %1425 = vmatpush.bf16.msrb.mxu2 %v2116_v62  ;;  %v2083_v35 = vld [vmem:[#allocation11 + $0x228] sm:$0xf]  ;;  %v2467_v37 = vld [vmem:[#allocation11 + $0x234] sm:$0xf0]  ;;  %vm925_vm4 = vcmp.eq.f32.partialorder %v924_v50, 8.507059e+37 }
 0x160   :  { %v3193_v27 = vadd.f32 1.0, %v2569_v22  ;;  %v889_v29 = vadd.f32 %v888_v14, %v876_v16  ;;  %v2471_v14 = vld [vmem:[#allocation11 + $0x254] sm:$0xf0]  ;;  %1438 = vmatpush.bf16.msrb.mxu3 %v2244_v6  ;;  %v927_v43 = vor.u32 1.1754944e-38, %v926_v17  ;;  %v2069_v62 = vld [vmem:[#allocation11 + $0x218] sm:$0xf0] }
 0x161   :  { %1462 = vmatpush.bf16.msra.mxu1 %v2280_v32  ;;  %v2503_v22 = vld [vmem:[#allocation11 + $0x354] sm:$0xf0]  ;;  %v2232_v32 = vor.u32 %v2501_v28, %v2229_v34  ;;  %v2538_v28 = vld [vmem:[#allocation13 + $0x74] sm:$0xf] }
 0x162   :  { %2572 = vrcp.f32 %v3193_v27  ;;  %v2055_v39 = vmul.f32 -1.442695, %v889_v29  ;;  %v849_v40 = vpop.f32.mrf.mxu2  ;;  %v905_v51 = vand.u32 2147483647, %v3193_v27  ;;  %v907_v18 = vand.u32 2147483648, %v3193_v27 }
 0x163   :  { %v862_v41 = vpop.f32.mrf.mxu3  ;;  %v3197_v44 = vpop.eup %2570  ;;  %v850_v49 = vadd.f32 %v849_v40, %v455_v30  ;;  %v2100_v29 = vor.u32 %v2471_v14, %v2099_v13  ;;  %v2101_v30 = vld [vmem:[#allocation11 + $0x258] sm:$0xf0]  ;;  %v2228_v31 = vor.u32 %v2503_v22, %v2227_v15  ;;  %v2211_v40 = vld [vmem:[#allocation11 + $0x328] sm:$0xf]  ;;  %vm901_vm7 = vweird.f32 %v3193_v27 }
 0x164   :  { %v916_v48 = vmul.f32 %v3197_v44, %v3190_v4  ;;  %2574 = vpow2.f32 %v2055_v39  ;;  %vm921_vm14 = vweird.f32 %v3197_v44  ;;  %v2104_v33 = vor.u32 %v2469_v23, %v2101_v30  ;;  %v2539_v30 = vld [vmem:[#allocation13 + $0x74] sm:$0xf0] }
 0x165   :  { %v877_v52 = vpop.f32.mrf.mxu0  ;;  %v890_v53 = vpop.f32.mrf.mxu1  ;;  %v863_v3 = vadd.f32 %v862_v41, %v850_v49  ;;  %1463 = vmatpush.bf16.msra.mxu1 %v2264_v59  ;;  %vm3215_vm12 = vmor %vm920_vm10, %vm921_vm14  ;;  %v2499_v41 = vld [vmem:[#allocation11 + $0x334] sm:$0xf0]  ;;  %vm3233_vm9 = vcmp.eq.f32.partialorder %v905_v51, 8.507059e+37  ;;  %1426 = vmatpush.bf16.msrb.mxu2 %v2100_v29  ;;  %v908_v50 = vor.u32 1.1754944e-38, %v907_v18  ;;  %v2067_v51 = vld [vmem:[#allocation11 + $0x208] sm:$0xf] }
 0x166   :  { %v917_v58 = vsub.f32 1.0, %v916_v48  ;;  %1439 = vmatpush.bf16.msrb.mxu3 %v2228_v31  ;;  %1452 = vmatpush.bf16.msra.mxu0 %v2104_v33  ;;  %v2212_v53 = vor.u32 %v2499_v41, %v2211_v40  ;;  %v2461_v59 = vld [vmem:[#allocation11 + $0x20c] sm:$0xf]  ;;  %v2068_v6 = vor.u32 %v2463_v54, %v2067_v51  ;;  %v2376_v33 = vld [vmem:[#allocation13 + $0x78] sm:$0xf0] }
 0x167   :  { %2576 = vtanh.f32 %v863_v3  ;;  %v2072_v8 = vor.u32 %v2461_v59, %v2069_v62  ;;  %v2379_v34 = vor.u32 %v2538_v28, %v2376_v33  ;;  %v2368_v41 = vld [vmem:[#allocation13 + $0x68] sm:$0xf0]  ;;  %v2360_v49 = vld [vmem:[#allocation13 + $0x58] sm:$0xf0]  ;;  %v2532_v51 = vld [vmem:[#allocation13 + $0x44] sm:$0xf] }
 0x168   :  { %v3203_v1 = vpop.eup %2572  ;;  %v918_v2 = vmul.f32 %v3197_v44, %v917_v58  ;;  %v2495_v58 = vld [vmem:[#allocation11 + $0x314] sm:$0xf0]  ;;  %v2352_v54 = vld [vmem:[#allocation13 + $0x48] sm:$0xf0] }
 0x169   :  { %v897_v10 = vmul.f32 %v3203_v1, %v3193_v27  ;;  %vm902_vm5 = vweird.f32 %v3203_v1  ;;  %1464 = vmatpush.bf16.msra.mxu1 %v2248_v12  ;;  %v2088_v27 = vor.u32 %v2465_v45, %v2085_v46  ;;  %v2358_v45 = vld [vmem:[#allocation13 + $0x50] sm:$0xf]  ;;  %v2535_v46 = vld [vmem:[#allocation13 + $0x54] sm:$0xf0] }
 0x16a   :  { %v2575_v16 = vpop.eup %2574  ;;  %v919_v19 = vadd.f32 %v3197_v44, %v918_v2  ;;  %v851_v20 = vpop.f32.mrf.mxu2  ;;  %vm3239_vm11 = vmor %vm901_vm7, %vm902_vm5  ;;  %1440 = vmatpush.bf16.msrb.mxu3 %v2212_v53 }
 0x16b   :  { %v864_v21 = vpop.f32.mrf.mxu3  ;;  %v898_v25 = vsub.f32 1.0, %v897_v10  ;;  %v3219_v26 = vadd.f32 1.0, %v2575_v16  ;;  %1453 = vmatpush.bf16.msra.mxu0 %v2088_v27  ;;  %v2200_v10 = vor.u32 %v2493_v63, %v2197_v5  ;;  %v2530_v5 = vld [vmem:[#allocation13 + $0x34] sm:$0xf] }
 0x16c   :  { %v923_v39 = vsel %vm3215_vm12, %v3197_v44, %v919_v19  ;;  %v2084_v44 = vor.u32 %v2467_v37, %v2083_v35  ;;  %v130_v19 = vld [vmem:[#allocation7 + $0x8] sm:$0xff]  ;;  %v3255_v35 = vld [vmem:[%s3290_s5 + $0x4] sm:$0xf]  ;;  %v2366_v37 = vld [vmem:[#allocation13 + $0x60] sm:$0xf] }
 0x16d   :  { %2578 = vrcp.f32 %v3219_v26  ;;  %v899_v38 = vmul.f32 %v3203_v1, %v898_v25  ;;  %v928_v52 = vsel %vm925_vm4, %v927_v43, %v923_v39  ;;  %1465 = vmatpush.bf16.msra.mxu1 %v2232_v32  ;;  %v2577_v60 = vpop.eup %2576  ;;  %v946_v12 = vand.u32 2147483648, %v3219_v26  ;;  %v2536_v39 = vld [vmem:[#allocation13 + $0x64] sm:$0xf] }
 0x16e   :  { %v950_v2 = vmul.f32 %v928_v52, %v133_v47  ;;  %1427 = vmatpush.bf16.msrb.mxu2 %v2084_v44  ;;  %v944_v14 = vand.u32 2147483647, %v3219_v26  ;;  %vm940_vm13 = vweird.f32 %v3219_v26  ;;  %v2371_v43 = vor.u32 %v2536_v39, %v2368_v41  ;;  %v2534_v47 = vld [vmem:[#allocation13 + $0x54] sm:$0xf]  ;;  %v2533_v52 = vld [vmem:[#allocation13 + $0x44] sm:$0xf0] }
 0x16f   :  { %v900_v48 = vadd.f32 %v3203_v1, %v899_v38  ;;  %1454 = vmatpush.bf16.msra.mxu0 %v2072_v8  ;;  %v947_v16 = vor.u32 1.1754944e-38, %v946_v12  ;;  %v2537_v38 = vld [vmem:[#allocation13 + $0x64] sm:$0xf0]  ;;  %v1035_v32 = vperm.slane %v3255_v35, 1  ;;  %v2363_v44 = vor.u32 %v2534_v47, %v2360_v49  ;;  %v2336_v12 = vld [vmem:[#allocation13 + $0x28] sm:$0xf0] }
 0x170   :  { %vm945_vm0 = vcmp.eq.f32.partialorder %v944_v14, 8.507059e+37  ;;  %v2367_v40 = vor.u32 %v2537_v38, %v2366_v37  ;;  %v1034_v53 = vperm.slane %v3255_v35, 0  ;;  %v2529_v8 = vld [vmem:[#allocation13 + $0x24] sm:$0xf0]  ;;  %v2326_v14 = vld [vmem:[#allocation13 + $0x10] sm:$0xf] }
 0x171   :  { %v904_v55 = vsel %vm3239_vm11, %v3203_v1, %v900_v48  ;;  %v2196_v1 = vor.u32 %v2495_v58, %v2195_v57  ;;  %1466 = vmatpush.bf16.msra.mxu1 %v2216_v56  ;;  %v2359_v48 = vor.u32 %v2535_v46, %v2358_v45  ;;  %v2355_v56 = vor.u32 %v2532_v51, %v2352_v54 }
 0x172   :  { %v909_v61 = vsel %vm3233_vm9, %v908_v50, %v904_v55  ;;  %1428 = vmatpush.bf16.msrb.mxu2 %v2068_v6  ;;  %v2350_v50 = vld [vmem:[#allocation13 + $0x40] sm:$0xf]  ;;  %v1036_v41 = vperm.slane %v3255_v35, 2 }
 0x173   :  { %v2579_v0 = vpop.eup %2578  ;;  %v951_v3 = vmul.f32 %v2577_v60, %v909_v61  ;;  %1441 = vmatpush.bf16.msrb.mxu3 %v2196_v1  ;;  %v2351_v27 = vor.u32 %v2533_v52, %v2350_v50  ;;  %v2342_v60 = vld [vmem:[#allocation13 + $0x30] sm:$0xf]  ;;  %v2531_v61 = vld [vmem:[#allocation13 + $0x34] sm:$0xf0]  ;;  %v2334_v1 = vld [vmem:[#allocation13 + $0x20] sm:$0xf] }
 0x174   :  { %v936_v7 = vmul.f32 %v2579_v0, %v3219_v26  ;;  %vm941_vm15 = vweird.f32 %v2579_v0  ;;  %v2374_v26 = vld [vmem:[#allocation13 + $0x70] sm:$0xf]  ;;  %v2343_v63 = vor.u32 %v2531_v61, %v2342_v60 }
 0x175   :  { %v952_v9 = vadd.f32 %v951_v3, %v950_v2  ;;  %1467 = vmatpush.bf16.msra.mxu1 %v2200_v10  ;;  %vm942_vm2 = vmor %vm940_vm13, %vm941_vm15  ;;  %v2375_v31 = vor.u32 %v2539_v30, %v2374_v26  ;;  %v2524_v26 = vld [vmem:[#allocation13 + $0x4] sm:$0xf]  ;;  %v2320_v30 = vld [vmem:[#allocation13 + $0x8] sm:$0xf0] }
 0x176   :  { %v937_v11 = vsub.f32 1.0, %v936_v7  ;;  %v2323_v37 = vor.u32 %v2524_v26, %v2320_v30 }
 0x177   :  { %2580 = vtanh.f32 %v952_v9  ;;  %956 = vst [vmem:[#allocation17] sm:$0xff] %v952_v9  ;;  %v2528_v9 = vld [vmem:[#allocation13 + $0x24] sm:$0xf] }
 0x178   :  { %v938_v13 = vmul.f32 %v2579_v0, %v937_v11  ;;  %v2335_v11 = vor.u32 %v2529_v8, %v2334_v1 }
 0x17a   :  { %v939_v15 = vadd.f32 %v2579_v0, %v938_v13  ;;  %v2339_v13 = vor.u32 %v2528_v9, %v2336_v12 }
 0x17c   :  { %v943_v17 = vsel %vm942_vm2, %v2579_v0, %v939_v15  ;;  %v2344_v0 = vld [vmem:[#allocation13 + $0x38] sm:$0xf0]  ;;  %v2527_v15 = vld [vmem:[#allocation13 + $0x14] sm:$0xf0] }
 0x17d   :  { %v2581_v18 = vpop.eup %2580  ;;  %v948_v20 = vsel %vm945_vm0, %v947_v16, %v943_v17  ;;  %v2347_v2 = vor.u32 %v2530_v5, %v2344_v0  ;;  %v2526_v16 = vld [vmem:[#allocation13 + $0x14] sm:$0xf]  ;;  %v2327_v17 = vor.u32 %v2527_v15, %v2326_v14  ;;  %v134_v0 = vld [vmem:[#allocation8 + $0x8] sm:$0xff] }
 0x17e   :  { %v954_v21 = vmul.f32 %v2581_v18, %v948_v20  ;;  %v2328_v18 = vld [vmem:[#allocation13 + $0x18] sm:$0xf0] }
 0x180   :  { %v2548_v22 = vpack.c.bf16 %v130_v19, %v954_v21  ;;  %955 = vst [vmem:[#allocation15] sm:$0xff] %v954_v21 }
 0x182   :  { %v1043_v23 = vunpack.c.l.b16 %v2548_v22  ;;  %v1044_v24 = vunpack.c.h.b16 %v2548_v22  ;;  %v1037_v22 = vperm.slane %v3255_v35, 3 }
 0x184   :  { %v1045_v25 = vpack.c.b16 %v1043_v23, %v1043_v23  ;;  %v1046_v29 = vpack.c.b16 %v1044_v24, %v1044_v24  ;;  %v2331_v23 = vor.u32 %v2526_v16, %v2328_v18  ;;  %v2318_v24 = vld [vmem:[#allocation13] sm:$0xf] }
 0x186   :  { %1377 = vmatmul.bf16.vlgmr.msra.gmra.mxu2 %v1045_v25  ;;  %1390 = vmatmul.bf16.vlgmr.msra.gmra.mxu3 %v1046_v29 }
 0x187   :  { %1403 = vmatmul.bf16.vlgmr.msrb.gmra.mxu0 %v1045_v25  ;;  %1416 = vmatmul.bf16.vlgmr.msrb.gmra.mxu1 %v1046_v29 }
 0x188   :  { %1641 = vmatpush.bf16.msra.mxu2 %v2375_v31  ;;  %1654 = vmatpush.bf16.msra.mxu3 %v2379_v34 }
 0x18c   :  { %1642 = vmatpush.bf16.msra.mxu2 %v2367_v40  ;;  %1655 = vmatpush.bf16.msra.mxu3 %v2371_v43 }
 0x190   :  { %1643 = vmatpush.bf16.msra.mxu2 %v2359_v48  ;;  %1656 = vmatpush.bf16.msra.mxu3 %v2363_v44 }
 0x194   :  { %1644 = vmatpush.bf16.msra.mxu2 %v2351_v27  ;;  %1657 = vmatpush.bf16.msra.mxu3 %v2355_v56 }
 0x196   :  { %1429 = vmatmul.bf16.vlgmr.msrb.gmra.mxu2 %v1045_v25  ;;  %1442 = vmatmul.bf16.vlgmr.msrb.gmra.mxu3 %v1046_v29 }
 0x197   :  { %1455 = vmatmul.bf16.vlgmr.msra.gmra.mxu0 %v1045_v25  ;;  %1468 = vmatmul.bf16.vlgmr.msra.gmra.mxu1 %v1046_v29  ;;  %v2525_v25 = vld [vmem:[#allocation13 + $0x4] sm:$0xf0] }
 0x198   :  { %1645 = vmatpush.bf16.msra.mxu2 %v2343_v63  ;;  %1658 = vmatpush.bf16.msra.mxu3 %v2347_v2  ;;  %v2319_v33 = vor.u32 %v2525_v25, %v2318_v24  ;;  %v1555_v24 = vld [vmem:[%s3292_s7] sm:$0x3] }
 0x199   :  { %v1557_v25 = vperm.slane %v1555_v24, 0 }
 0x19c   :  { %1646 = vmatpush.bf16.msra.mxu2 %v2335_v11  ;;  %1659 = vmatpush.bf16.msra.mxu3 %v2339_v13 }
 0x1a0   :  { %1647 = vmatpush.bf16.msra.mxu2 %v2327_v17  ;;  %1660 = vmatpush.bf16.msra.mxu3 %v2331_v23 }
 0x1a4   :  { %1648 = vmatpush.bf16.msra.mxu2 %v2319_v33  ;;  %1661 = vmatpush.bf16.msra.mxu3 %v2323_v37 }
 0x204   :  { %v1404_v36 = vpop.f32.mrf.mxu0  ;;  %v1417_v42 = vpop.f32.mrf.mxu1 }
 0x205   :  { %v1405_v4 = vadd.f32 %v1404_v36, %v1035_v32 }
 0x207   :  { %v1418_v55 = vadd.f32 %v1417_v42, %v1405_v4 }
 0x209   :  { %v2314_v57 = vmul.f32 -1.442695, %v1418_v55  ;;  %v1378_v58 = vpop.f32.mrf.mxu2  ;;  %v1391_v59 = vpop.f32.mrf.mxu3 }
 0x20a   :  { %v1379_v62 = vadd.f32 %v1378_v58, %v1034_v53 }
 0x20b   :  { %2582 = vpow2.f32 %v2314_v57 }
 0x20c   :  { %v1392_v3 = vadd.f32 %v1391_v59, %v1379_v62  ;;  %v1406_v6 = vpop.f32.mrf.mxu0  ;;  %v1419_v7 = vpop.f32.mrf.mxu1 }
 0x20e   :  { %v2313_v10 = vmul.f32 -1.442695, %v1392_v3 }
 0x210   :  { %2584 = vpow2.f32 %v2313_v10 }
 0x211   :  { %v2583_v19 = vpop.eup %2582  ;;  %v1380_v20 = vpop.f32.mrf.mxu2 }
 0x212   :  { %v1393_v21 = vpop.f32.mrf.mxu3  ;;  %v1495_v29 = vadd.f32 1.0, %v2583_v19 }
 0x214   :  { %2586 = vrcp.f32 %v1495_v29  ;;  %v1456_v28 = vpop.f32.mrf.mxu0  ;;  %v1469_v31 = vpop.f32.mrf.mxu1  ;;  %v1507_v35 = vand.u32 2147483648, %v1495_v29  ;;  %vm1501_vm6 = vweird.f32 %v1495_v29  ;;  %v1505_v57 = vand.u32 2147483647, %v1495_v29 }
 0x215   :  { %v1457_v34 = vadd.f32 %v1456_v28, %v1037_v22 }
 0x216   :  { %v2585_v38 = vpop.eup %2584  ;;  %v1508_v63 = vor.u32 1.1754944e-38, %v1507_v35  ;;  %vm1506_vm10 = vcmp.eq.f32.partialorder %v1505_v57, 8.507059e+37 }
 0x217   :  { %v1476_v39 = vadd.f32 1.0, %v2585_v38  ;;  %v1470_v40 = vadd.f32 %v1469_v31, %v1457_v34 }
 0x219   :  { %2588 = vrcp.f32 %v1476_v39  ;;  %v2315_v43 = vmul.f32 -1.442695, %v1470_v40  ;;  %v1430_v32 = vpop.f32.mrf.mxu2  ;;  %v1486_v59 = vand.u32 2147483647, %v1476_v39  ;;  %v1488_v60 = vand.u32 2147483648, %v1476_v39 }
 0x21a   :  { %v1443_v45 = vpop.f32.mrf.mxu3  ;;  %v2587_v46 = vpop.eup %2586  ;;  %v1431_v48 = vadd.f32 %v1430_v32, %v1036_v41  ;;  %vm1482_vm14 = vweird.f32 %v1476_v39 }
 0x21b   :  { %v1497_v47 = vmul.f32 %v2587_v46, %v1495_v29  ;;  %2590 = vpow2.f32 %v2315_v43  ;;  %vm1502_vm3 = vweird.f32 %v2587_v46  ;;  %v1489_v2 = vor.u32 1.1754944e-38, %v1488_v60 }
 0x21c   :  { %v1458_v49 = vpop.f32.mrf.mxu0  ;;  %v1471_v44 = vpop.f32.mrf.mxu1  ;;  %v1444_v50 = vadd.f32 %v1443_v45, %v1431_v48  ;;  %vm3261_vm1 = vmor %vm1501_vm6, %vm1502_vm3  ;;  %vm1487_vm5 = vcmp.eq.f32.partialorder %v1486_v59, 8.507059e+37  ;;  %v1558_v29 = vperm.slane %v1555_v24, 1 }
 0x21d   :  { %v1498_v36 = vsub.f32 1.0, %v1497_v47 }
 0x21e   :  { %2592 = vtanh.f32 %v1444_v50 }
 0x21f   :  { %v2589_v42 = vpop.eup %2588  ;;  %v1499_v4 = vmul.f32 %v2587_v46, %v1498_v36 }
 0x220   :  { %v1478_v52 = vmul.f32 %v2589_v42, %v1476_v39  ;;  %vm1483_vm8 = vweird.f32 %v2589_v42 }
 0x221   :  { %v2591_v53 = vpop.eup %2590  ;;  %v1500_v27 = vadd.f32 %v2587_v46, %v1499_v4  ;;  %v1432_v51 = vpop.f32.mrf.mxu2  ;;  %vm1484_vm12 = vmor %vm1482_vm14, %vm1483_vm8 }
 0x222   :  { %v1445_v54 = vpop.f32.mrf.mxu3  ;;  %v1479_v55 = vsub.f32 1.0, %v1478_v52  ;;  %v1515_v56 = vadd.f32 1.0, %v2591_v53 }
 0x223   :  { %v1504_v62 = vsel %vm3261_vm1, %v2587_v46, %v1500_v27 }
 0x224   :  { %2594 = vrcp.f32 %v1515_v56  ;;  %v1480_v61 = vmul.f32 %v2589_v42, %v1479_v55  ;;  %v1509_v3 = vsel %vm1506_vm10, %v1508_v63, %v1504_v62  ;;  %v2593_v7 = vpop.eup %2592  ;;  %v1527_v14 = vand.u32 2147483648, %v1515_v56 }
 0x225   :  { %v1531_v9 = vmul.f32 %v1509_v3, %v134_v0  ;;  %v1525_v16 = vand.u32 2147483647, %v1515_v56  ;;  %vm1521_vm7 = vweird.f32 %v1515_v56 }
 0x226   :  { %v1481_v5 = vadd.f32 %v2589_v42, %v1480_v61  ;;  %v1528_v18 = vor.u32 1.1754944e-38, %v1527_v14 }
 0x227   :  { %vm1526_vm11 = vcmp.eq.f32.partialorder %v1525_v16, 8.507059e+37 }
 0x228   :  { %v1485_v6 = vsel %vm1484_vm12, %v2589_v42, %v1481_v5 }
 0x229   :  { %v1490_v1 = vsel %vm1487_vm5, %v1489_v2, %v1485_v6 }
 0x22a   :  { %v2595_v8 = vpop.eup %2594  ;;  %v1532_v10 = vmul.f32 %v2593_v7, %v1490_v1 }
 0x22b   :  { %v1517_v11 = vmul.f32 %v2595_v8, %v1515_v56  ;;  %vm1522_vm4 = vweird.f32 %v2595_v8 }
 0x22c   :  { %v1533_v12 = vadd.f32 %v1532_v10, %v1531_v9  ;;  %vm1523_vm9 = vmor %vm1521_vm7, %vm1522_vm4 }
 0x22d   :  { %v1518_v13 = vsub.f32 1.0, %v1517_v11 }
 0x22e   :  { %2596 = vtanh.f32 %v1533_v12  ;;  %1537 = vst [vmem:[#allocation17 + $0x8] sm:$0xff] %v1533_v12 }
 0x22f   :  { %v1519_v15 = vmul.f32 %v2595_v8, %v1518_v13 }
 0x231   :  { %v1520_v17 = vadd.f32 %v2595_v8, %v1519_v15 }
 0x233   :  { %v1524_v19 = vsel %vm1523_vm9, %v2595_v8, %v1520_v17 }
 0x234   :  { %v2597_v20 = vpop.eup %2596  ;;  %v1529_v21 = vsel %vm1526_vm11, %v1528_v18, %v1524_v19 }
 0x235   :  { %v1535_v22 = vmul.f32 %v2597_v20, %v1529_v21 }
 0x237   :  { %v1538_v23 = vpack.c.bf16 %v1535_v22, %v1535_v22  ;;  %1536 = vst [vmem:[#allocation15 + $0x8] sm:$0xff] %v1535_v22 }
 0x238   :  { %1692 = dma.vmem_to_hbm [thread:$0]  %s1685_s0, 256, %s1687_s15, [#allocation16], %s2815_s21, %s2815_s21, %s2816_s22  }
 0x239   :  { %1649 = vmatmul.bf16.vlgmr.msra.gmra.mxu2 %v1538_v23  ;;  %1662 = vmatmul.bf16.vlgmr.msra.gmra.mxu3 %v1538_v23  ;;  %1705 = dma.vmem_to_hbm [thread:$0]  %s1698_s18, 256, %s1700_s20, [#allocation16], %s2815_s21, %s2815_s21, %s2816_s22  }
 0x2bc   :  { %v1650_v26 = vpop.f32.mrf.mxu2  ;;  %v1663_v30 = vpop.f32.mrf.mxu3 }
 0x2bd   :  { %v1651_v28 = vadd.f32 %v1650_v26, %v1557_v25  ;;  %v1664_v31 = vadd.f32 %v1663_v30, %v1558_v29 }
 0x2bf   :  { %1667 = vst [vmem:[#allocation14] sm:$0xff] %v1651_v28 }
 0x2c0   :  { %1668 = vst [vmem:[#allocation14 + $0x8] sm:$0xff] %v1664_v31 }
 0x2c1   :  { %1679 = dma.vmem_to_hbm [thread:$0]  %s1675_s25, 256, %s1677_s2, [#allocation5]  }
 0x2c4   :  { %v1652_v33 = vpop.f32.mrf.mxu2  ;;  %v1665_v34 = vpop.f32.mrf.mxu3 }
 0x2c5   :  { %2810 = dma.done.wait [#allocation5], 256  }
 0x2c6   :  { %2811 = vsyncadd [#allocation5], 4294967040 }
 0x2c7   :  { %2812 = dma.done.wait [#allocation16], 512  }
 0x2c8   :  { %2813 = vsyncadd [#allocation16], 4294966784 }
 0x2c9   :  { %1718 = vsyncpa [#allocation4], 1 }
 0x2ca   :  { %1719 = vsyncpa [#allocation9], 1 }
 0x2cb   :  { %1720 = vsyncpa [#allocation12], 1 }
 0x2cc   :  { %1721 = vsyncpa [#allocation5], 1 }
 0x2cd   :  { %1722 = vsyncpa [#allocation16], 1 }
 0x2ce   :  { %1723 = vsyncpa [#allocation6], 1 }

</bundles_post_ra>
